<compile_context>
chip_gen: v7x
topology: tpu7x:2x2x1
jax: 0.10.0
libtpu: 0.0.40
codegen_flags: <defaults>
</compile_context>

<pallas_src>
import math
from functools import partial

import numpy as np
import jax
import jax.numpy as jnp
from jax.experimental import pallas as pl
from jax.experimental.pallas import tpu as pltpu

NEG_SLOPE = 0.01     # F.leaky_relu default negative_slope
BN_EPS = 1e-5        # nn.BatchNorm1d default eps
ROW_OFF = 8          # sublane-aligned row offset of the image inside the pad scratch


# ---------------------------------------------------------------------------
# Wrapper-side (one-time) weight transforms
# ---------------------------------------------------------------------------
def _banded_conv_weights(w_hwio, H, W, P):
    """HWIO conv weights (K,K,Cin,Cout) -> (K, W*Cin, OW*Cout) banded matmul weights.

    Output columns are ordered (w_parity, ow//2, cout) so the 2x-W max-pool is just a
    max of the two lane halves.  Zero padding along W is folded into the band structure.
    """
    K, _, Cin, Cout = w_hwio.shape
    OW = W + 2 * P - K + 1
    OW2 = OW // 2
    w = np.asarray(w_hwio, np.float32)
    bw = np.zeros((K, W * Cin, OW * Cout), np.float32)
    for ky in range(K):
        for ow in range(OW):
            q, ow2 = ow % 2, ow // 2
            col = (q * OW2 + ow2) * Cout
            for kx in range(K):
                w_in = ow - P + kx
                if 0 <= w_in < W:
                    bw[ky, w_in * Cin:(w_in + 1) * Cin, col:col + Cout] = w[ky, kx]
    return jnp.asarray(bw)


# ---------------------------------------------------------------------------
# In-kernel building block: Conv2d(k, stride=1, pad=P) + ReLU + MaxPool2d(2)
# ---------------------------------------------------------------------------
def _conv_relu_pool_block(x, pad_ref, bw_ref, bias_ref, H, W, Cin, Cout, K, P):
    """x: (H, W*Cin) value, columns ordered (w, c).
    Returns (OH//2, (OW//2)*Cout), columns ordered (w2, c)."""
    OH = H + 2 * P - K + 1
    OW = W + 2 * P - K + 1
    OH2, OW2 = OH // 2, OW // 2
    half = OW2 * Cout

    # Zero the padding scratch, drop the image at a sublane-aligned row offset.
    pad_ref[...] = jnp.zeros_like(pad_ref)
    pad_ref[ROW_OFF:ROW_OFF + H, :] = x

    r0 = ROW_OFF - P
    acc_e = jnp.zeros((OH2, OW * Cout), jnp.float32)   # even output rows
    acc_o = jnp.zeros((OH2, OW * Cout), jnp.float32)   # odd output rows
    for ky in range(K):
        bwk = bw_ref[ky]                                               # (W*Cin, OW*Cout)
        lhs_e = pad_ref[pl.ds(r0 + ky, OH2, stride=2), :]              # stride-2 row loads
        lhs_o = pad_ref[pl.ds(r0 + ky + 1, OH2, stride=2), :]
        acc_e = acc_e + jnp.dot(lhs_e, bwk, preferred_element_type=jnp.float32)
        acc_o = acc_o + jnp.dot(lhs_o, bwk, preferred_element_type=jnp.float32)

    # MaxPool2d(2): H-pool = max(even, odd); W-pool = max of the two lane halves.
    hpool = jnp.maximum(acc_e, acc_o)                                  # (OH2, OW*Cout)
    pooled = jnp.maximum(hpool[:, :half], hpool[:, half:])             # (OH2, OW2*Cout)
    # Bias + ReLU commute with max-pool -> apply once on the pooled map.
    return jnp.maximum(pooled + bias_ref[...], 0.0)


# ---------------------------------------------------------------------------
# Fused forward kernel (one image per grid step)
# ---------------------------------------------------------------------------
def _fused_forward_kernel(x_ref, bw1_ref, cb1_ref, bw2_ref, cb2_ref,
                          lw1_ref, lb1_ref, lw2_ref, lb2_ref, lw3_ref, lb3_ref,
                          bns_ref, bnb_ref,
                          out_ref,
                          pad1_ref, pad2_ref,
                          *, geom):
    g1, g2 = geom
    x = x_ref[0]                                                       # (H, W*Cin)

    a1 = _conv_relu_pool_block(x, pad1_ref, bw1_ref, cb1_ref, *g1)     # (H2, W2*C1)
    a2 = _conv_relu_pool_block(a1, pad2_ref, bw2_ref, cb2_ref, *g2)    # (PH2, PW2*C2)

    # linear_1 without an in-kernel flatten: PH2 row-sliced matmuls.
    PH2 = a2.shape[0]
    z = lb1_ref[...]                                                   # (1, 200)
    for h in range(PH2):
        z = z + jnp.dot(a2[h:h + 1, :], lw1_ref[h],
                        preferred_element_type=jnp.float32)
    z = jnp.where(z >= 0.0, z, NEG_SLOPE * z)                          # leaky_relu

    # linear_2 + leaky_relu  (= leaky_class_weights)
    lcw = jnp.dot(z, lw2_ref[...], preferred_element_type=jnp.float32) + lb2_ref[...]
    lcw = jnp.where(lcw >= 0.0, lcw, NEG_SLOPE * lcw)

    # softmax over the 10 classes + weighted mix
    m = jnp.max(lcw, axis=1, keepdims=True)
    e = jnp.exp(lcw - m)
    probs = e / jnp.sum(e, axis=1, keepdims=True)
    total = jnp.sum(lcw, axis=1, keepdims=True)
    mix = lcw * 0.01 + total * probs * 0.99

    # BatchNorm1d(10) eval mode, pre-folded to scale/shift
    mix = mix * bns_ref[...] + bnb_ref[...]

    # linear_3 -> (1, 1)
    out = jnp.dot(mix, lw3_ref[...], preferred_element_type=jnp.float32) + lb3_ref[...]
    out_ref[0] = out.astype(out_ref.dtype)


# ---------------------------------------------------------------------------
# Wrapper: one fused pallas_call for the whole eval-mode forward
# ---------------------------------------------------------------------------
def leaky_softmax_cnn_forward(x_nchw, params):
    x = jnp.transpose(x_nchw, (0, 2, 3, 1)).astype(jnp.float32)        # NCHW -> NHWC
    N, H, W, C0 = x.shape
    x2d = x.reshape(N, H, W * C0)                                      # columns (w, c)

    (cw1, cb1), (cw2, cb2) = params["conv"]
    K1, K2 = params["kernel_sizes"]
    P1, P2 = params["paddings"]
    C1, C2 = cw1.shape[-1], cw2.shape[-1]

    # Static layer geometry (stride-1 conv + 2x2 max pool).
    OH1, OW1 = H + 2 * P1 - K1 + 1, W + 2 * P1 - K1 + 1
    H2, W2 = OH1 // 2, OW1 // 2
    OH2, OW2 = H2 + 2 * P2 - K2 + 1, W2 + 2 * P2 - K2 + 1
    PH2, PW2 = OH2 // 2, OW2 // 2
    assert OH1 % 2 == 0 and OW1 % 2 == 0 and OH2 % 2 == 0 and OW2 % 2 == 0
    assert max(P1, P2) <= ROW_OFF

    # One-time glue: banded conv weights + lane-tiled pooled biases.
    bw1 = _banded_conv_weights(cw1, H, W, P1)                          # (K1, W*C0,  OW1*C1)
    bw2 = _banded_conv_weights(cw2, H2, W2, P2)                        # (K2, W2*C1, OW2*C2)
    bias1 = jnp.tile(cb1, (1, OW1 // 2))                               # (1, (OW1/2)*C1)
    bias2 = jnp.tile(cb2, (1, OW2 // 2))                               # (1, (OW2/2)*C2)

    lw1, lb1 = params["lin1"]
    lw2, lb2 = params["lin2"]
    lw3, lb3 = params["lin3"]
    bn_scale, bn_shift = params["bn_scale"], params["bn_shift"]
    assert lw1.shape[0] == PH2 * PW2 * C2
    lw1_3d = lw1.reshape(PH2, PW2 * C2, lw1.shape[1])                  # rows (h, (w,c))

    geom = ((H, W, C0, C1, K1, P1), (H2, W2, C1, C2, K2, P2))
    kernel = partial(_fused_forward_kernel, geom=geom)

    out = pl.pallas_call(
        kernel,
        out_shape=jax.ShapeDtypeStruct((N, 1, 1), jnp.float32),
        grid_spec=pltpu.PrefetchScalarGridSpec(
            num_scalar_prefetch=0,
            grid=(N,),
            in_specs=[
                pl.BlockSpec((1, H, W * C0), lambda n: (n, 0, 0)),     # image
                pl.BlockSpec(bw1.shape, lambda n: (0, 0, 0)),          # conv1 banded w
                pl.BlockSpec(bias1.shape, lambda n: (0, 0)),           # conv1 bias
                pl.BlockSpec(bw2.shape, lambda n: (0, 0, 0)),          # conv2 banded w
                pl.BlockSpec(bias2.shape, lambda n: (0, 0)),           # conv2 bias
                pl.BlockSpec(lw1_3d.shape, lambda n: (0, 0, 0)),       # linear_1
                pl.BlockSpec(lb1.shape, lambda n: (0, 0)),
                pl.BlockSpec(lw2.shape, lambda n: (0, 0)),             # linear_2
                pl.BlockSpec(lb2.shape, lambda n: (0, 0)),
                pl.BlockSpec(lw3.shape, lambda n: (0, 0)),             # linear_3
                pl.BlockSpec(lb3.shape, lambda n: (0, 0)),
                pl.BlockSpec(bn_scale.shape, lambda n: (0, 0)),        # bn scale
                pl.BlockSpec(bn_shift.shape, lambda n: (0, 0)),        # bn shift
            ],
            out_specs=pl.BlockSpec((1, 1, 1), lambda n: (n, 0, 0)),
            scratch_shapes=[
                pltpu.VMEM((ROW_OFF + H + P1, W * C0), jnp.float32),   # pad1
                pltpu.VMEM((ROW_OFF + H2 + P2, W2 * C1), jnp.float32), # pad2
            ]),
        compiler_params=pltpu.CompilerParams(
            dimension_semantics=("parallel",)),
    )(x2d, bw1, bias1, bw2, bias2, lw1_3d, lb1, lw2, lb2, lw3, lb3,
      bn_scale, bn_shift)
    return out.reshape(N, 1)


# ---------------------------------------------------------------------------
# Deterministic parameter construction (float32; see TODOs at top of file)
# ---------------------------------------------------------------------------
def init_params(key, *, input_c, input_h, input_w, kernel_sizes, extra_padding,
                channel_sizes, final_c=5):
    del final_c   # stored by the torch module but never used in forward()
    n_conv = len(channel_sizes)
    keys = jax.random.split(key, 2 * n_conv + 3)
    params = {
        "kernel_sizes": tuple(kernel_sizes),
        "paddings": tuple((k - 1) // 2 + ep
                          for k, ep in zip(kernel_sizes, extra_padding)),
        "conv": [],
    }
    c, h, w = input_c, input_h, input_w
    for i, (k, ep, co) in enumerate(zip(kernel_sizes, extra_padding, channel_sizes)):
        std = math.sqrt(2.0 / (c * k * k))
        wgt = std * jax.random.normal(keys[2 * i], (k, k, c, co), dtype=jnp.float32)  # HWIO
        bias = 0.1 * jax.random.normal(keys[2 * i + 1], (1, co), dtype=jnp.float32)
        params["conv"].append((wgt, bias))
        c = co
        h = h // 2 + ep
        w = w // 2 + ep
    flat_dim = h * w * channel_sizes[-1]

    def linear(lk, d_in, d_out):
        k1, k2 = jax.random.split(lk)
        std = math.sqrt(1.0 / d_in)
        return (std * jax.random.normal(k1, (d_in, d_out), dtype=jnp.float32),
                0.1 * jax.random.normal(k2, (1, d_out), dtype=jnp.float32))

    params["lin1"] = linear(keys[-3], flat_dim, 200)
    params["lin2"] = linear(keys[-2], 200, 10)
    params["lin3"] = linear(keys[-1], 10, 1)

    # BatchNorm1d(10), eval mode with fresh running stats, folded to scale/shift.
    gamma = jnp.ones((1, 10), jnp.float32)
    beta = jnp.zeros((1, 10), jnp.float32)
    run_mean = jnp.zeros((1, 10), jnp.float32)
    run_var = jnp.ones((1, 10), jnp.float32)
    scale = gamma / jnp.sqrt(run_var + BN_EPS)
    params["bn_scale"] = scale
    params["bn_shift"] = beta - run_mean * scale
    return params


# ---------------------------------------------------------------------------
# Pure-JAX (XLA) reference of the same eval-mode forward, for a sanity check
# ---------------------------------------------------------------------------
def _reference_forward(x_nchw, params):
    x = jnp.transpose(x_nchw, (0, 2, 3, 1)).astype(jnp.float32)
    for (w, b), p in zip(params["conv"], params["paddings"]):
        x = jax.lax.conv_general_dilated(
            x, w, window_strides=(1, 1), padding=[(p, p), (p, p)],
            dimension_numbers=("NHWC", "HWIO", "NHWC"),
            precision=jax.lax.Precision.HIGHEST) + b.reshape(1, 1, 1, -1)
        x = jnp.maximum(x, 0.0)
        N, H, W, C = x.shape
        x = x.reshape(N, H // 2, 2, W // 2, 2, C).max(axis=(2, 4))
    x = x.reshape(x.shape[0], -1)                        # (h, w, c) flatten order
    lw1, lb1 = params["lin1"]
    lw2, lb2 = params["lin2"]
    lw3, lb3 = params["lin3"]
    z = x @ lw1 + lb1
    z = jnp.where(z >= 0, z, NEG_SLOPE * z)
    lcw = z @ lw2 + lb2
    lcw = jnp.where(lcw >= 0, lcw, NEG_SLOPE * lcw)
    probs = jax.nn.softmax(lcw, axis=1)
    total = jnp.sum(lcw, axis=1, keepdims=True)
    mix = lcw * 0.01 + total * probs * 0.99
    mix = mix * params["bn_scale"] + params["bn_shift"]
    return mix @ lw3 + lb3


if __name__ == "__main__":
    key = jax.random.PRNGKey(0)
    k_param, k_data = jax.random.split(key)
    params = init_params(k_param, input_c=4, input_h=16, input_w=16,
                         kernel_sizes=[3, 3], extra_padding=[0, 0],
                         channel_sizes=[8, 16], final_c=5)
    x = jax.random.normal(k_data, (2, 4, 16, 16), dtype=jnp.float32)   # NCHW

    out = jax.block_until_ready(leaky_softmax_cnn_forward(x, params))
    ref = jax.block_until_ready(_reference_forward(x, params))

    assert out.shape == (2, 1) and out.dtype == jnp.float32
    # Generous tolerance: catches semantic/indexing errors, not MXU-vs-XLA
    # f32 matmul precision-mode differences.
    assert jnp.allclose(out, ref, atol=2e-2, rtol=2e-2), (out, ref)
    print("KERNEL_OK")
</pallas_src>

<mosaic_0001>
module attributes {stable_mosaic.version = 11 : i64} {
  func.func @_fused_forward_kernel(%arg0: i32, %arg1: memref<1x16x64xf32, #tpu.memory_space<vmem>>, %arg2: memref<3x64x128xf32, #tpu.memory_space<vmem>>, %arg3: memref<1x64xf32, #tpu.memory_space<vmem>>, %arg4: memref<3x64x128xf32, #tpu.memory_space<vmem>>, %arg5: memref<1x64xf32, #tpu.memory_space<vmem>>, %arg6: memref<4x64x200xf32, #tpu.memory_space<vmem>>, %arg7: memref<1x200xf32, #tpu.memory_space<vmem>>, %arg8: memref<200x10xf32, #tpu.memory_space<vmem>>, %arg9: memref<1x10xf32, #tpu.memory_space<vmem>>, %arg10: memref<10x1xf32, #tpu.memory_space<vmem>>, %arg11: memref<1x1xf32, #tpu.memory_space<vmem>>, %arg12: memref<1x10xf32, #tpu.memory_space<vmem>>, %arg13: memref<1x10xf32, #tpu.memory_space<vmem>>, %arg14: memref<1x1x1xf32, #tpu.memory_space<vmem>>, %arg15: memref<25x64xf32, #tpu.memory_space<vmem>>, %arg16: memref<17x64xf32, #tpu.memory_space<vmem>>) attributes {dimension_semantics = [#tpu.dimension_semantics<parallel>], iteration_bounds = array<i64: 2>, scalar_prefetch = 0 : i64, scratch_operands = 2 : i64, tpu.core_type = #tpu.core_type<tc>, window_params = [{transform_indices = @transform_0, window_bounds = array<i64: 1, 16, 64>}, {pipeline_mode = #tpu.pipeline_mode<synchronous>, transform_indices = @transform_1, window_bounds = array<i64: 3, 64, 128>}, {pipeline_mode = #tpu.pipeline_mode<synchronous>, transform_indices = @transform_2, window_bounds = array<i64: 1, 64>}, {pipeline_mode = #tpu.pipeline_mode<synchronous>, transform_indices = @transform_3, window_bounds = array<i64: 3, 64, 128>}, {pipeline_mode = #tpu.pipeline_mode<synchronous>, transform_indices = @transform_4, window_bounds = array<i64: 1, 64>}, {pipeline_mode = #tpu.pipeline_mode<synchronous>, transform_indices = @transform_5, window_bounds = array<i64: 4, 64, 200>}, {pipeline_mode = #tpu.pipeline_mode<synchronous>, transform_indices = @transform_6, window_bounds = array<i64: 1, 200>}, {pipeline_mode = #tpu.pipeline_mode<synchronous>, transform_indices = @transform_7, window_bounds = array<i64: 200, 10>}, {pipeline_mode = #tpu.pipeline_mode<synchronous>, transform_indices = @transform_8, window_bounds = array<i64: 1, 10>}, {pipeline_mode = #tpu.pipeline_mode<synchronous>, transform_indices = @transform_9, window_bounds = array<i64: 10, 1>}, {pipeline_mode = #tpu.pipeline_mode<synchronous>, transform_indices = @transform_10, window_bounds = array<i64: 1, 1>}, {pipeline_mode = #tpu.pipeline_mode<synchronous>, transform_indices = @transform_11, window_bounds = array<i64: 1, 10>}, {pipeline_mode = #tpu.pipeline_mode<synchronous>, transform_indices = @transform_12, window_bounds = array<i64: 1, 10>}, {transform_indices = @transform_13, window_bounds = array<i64: 1, 1, 1>}]} {
    %c0 = arith.constant 0 : index
    %c0_0 = arith.constant 0 : index
    %c0_1 = arith.constant 0 : index
    %0 = vector.load %arg1[%c0, %c0_0, %c0_1] : memref<1x16x64xf32, #tpu.memory_space<vmem>>, vector<1x16x64xf32>
    %1 = vector.shape_cast %0 : vector<1x16x64xf32> to vector<16x64xf32>
    %cst = arith.constant 0.000000e+00 : f32
    %2 = vector.broadcast %cst : f32 to vector<25x64xf32>
    %c0_2 = arith.constant 0 : index
    %c0_3 = arith.constant 0 : index
    %3 = vector.load %arg15[%c0_2, %c0_3] : memref<25x64xf32, #tpu.memory_space<vmem>>, vector<25x64xf32>
    tpu.vector_store %arg15[%c0_2, %c0_3], %2 {strides = array<i32>} : memref<25x64xf32, #tpu.memory_space<vmem>>, vector<25x64xf32>,
    %c8 = arith.constant 8 : index
    %c0_4 = arith.constant 0 : index
    %4 = vector.load %arg15[%c8, %c0_4] : memref<25x64xf32, #tpu.memory_space<vmem>>, vector<16x64xf32>
    tpu.vector_store %arg15[%c8, %c0_4], %1 {strides = array<i32>} : memref<25x64xf32, #tpu.memory_space<vmem>>, vector<16x64xf32>,
    %cst_5 = arith.constant 0.000000e+00 : f32
    %5 = vector.broadcast %cst_5 : f32 to vector<8x128xf32>
    %cst_6 = arith.constant 0.000000e+00 : f32
    %6 = vector.broadcast %cst_6 : f32 to vector<8x128xf32>
    %c0_7 = arith.constant 0 : index
    %c0_8 = arith.constant 0 : index
    %c0_9 = arith.constant 0 : index
    %7 = vector.load %arg2[%c0_7, %c0_8, %c0_9] : memref<3x64x128xf32, #tpu.memory_space<vmem>>, vector<1x64x128xf32>
    %8 = vector.shape_cast %7 : vector<1x64x128xf32> to vector<64x128xf32>
    %c7 = arith.constant 7 : index
    %c0_10 = arith.constant 0 : index
    %9 = tpu.strided_load %arg15[%c7, %c0_10] {strides = array<i32: 2, 1>} : memref<25x64xf32, #tpu.memory_space<vmem>>, vector<8x64xf32>
    %c8_11 = arith.constant 8 : index
    %c0_12 = arith.constant 0 : index
    %10 = tpu.strided_load %arg15[%c8_11, %c0_12] {strides = array<i32: 2, 1>} : memref<25x64xf32, #tpu.memory_space<vmem>>, vector<8x64xf32>
    %cst_13 = arith.constant dense<0.000000e+00> : vector<8x128xf32>
    %11 = tpu.matmul %9, %8, %cst_13 {dimension_numbers = #tpu.dot_dimension_numbers<[1], [0], [0], [1], [0, 0, 1, 1], [], []>} : vector<8x64xf32>, vector<64x128xf32>, vector<8x128xf32> -> vector<8x128xf32>
    %12 = arith.addf %5, %11 : vector<8x128xf32>
    %cst_14 = arith.constant dense<0.000000e+00> : vector<8x128xf32>
    %13 = tpu.matmul %10, %8, %cst_14 {dimension_numbers = #tpu.dot_dimension_numbers<[1], [0], [0], [1], [0, 0, 1, 1], [], []>} : vector<8x64xf32>, vector<64x128xf32>, vector<8x128xf32> -> vector<8x128xf32>
    %14 = arith.addf %6, %13 : vector<8x128xf32>
    %c1 = arith.constant 1 : index
    %c0_15 = arith.constant 0 : index
    %c0_16 = arith.constant 0 : index
    %15 = vector.load %arg2[%c1, %c0_15, %c0_16] : memref<3x64x128xf32, #tpu.memory_space<vmem>>, vector<1x64x128xf32>
    %16 = vector.shape_cast %15 : vector<1x64x128xf32> to vector<64x128xf32>
    %c8_17 = arith.constant 8 : index
    %c0_18 = arith.constant 0 : index
    %17 = tpu.strided_load %arg15[%c8_17, %c0_18] {strides = array<i32: 2, 1>} : memref<25x64xf32, #tpu.memory_space<vmem>>, vector<8x64xf32>
    %c9 = arith.constant 9 : index
    %c0_19 = arith.constant 0 : index
    %18 = tpu.strided_load %arg15[%c9, %c0_19] {strides = array<i32: 2, 1>} : memref<25x64xf32, #tpu.memory_space<vmem>>, vector<8x64xf32>
    %cst_20 = arith.constant dense<0.000000e+00> : vector<8x128xf32>
    %19 = tpu.matmul %17, %16, %cst_20 {dimension_numbers = #tpu.dot_dimension_numbers<[1], [0], [0], [1], [0, 0, 1, 1], [], []>} : vector<8x64xf32>, vector<64x128xf32>, vector<8x128xf32> -> vector<8x128xf32>
    %20 = arith.addf %12, %19 : vector<8x128xf32>
    %cst_21 = arith.constant dense<0.000000e+00> : vector<8x128xf32>
    %21 = tpu.matmul %18, %16, %cst_21 {dimension_numbers = #tpu.dot_dimension_numbers<[1], [0], [0], [1], [0, 0, 1, 1], [], []>} : vector<8x64xf32>, vector<64x128xf32>, vector<8x128xf32> -> vector<8x128xf32>
    %22 = arith.addf %14, %21 : vector<8x128xf32>
    %c2 = arith.constant 2 : index
    %c0_22 = arith.constant 0 : index
    %c0_23 = arith.constant 0 : index
    %23 = vector.load %arg2[%c2, %c0_22, %c0_23] : memref<3x64x128xf32, #tpu.memory_space<vmem>>, vector<1x64x128xf32>
    %24 = vector.shape_cast %23 : vector<1x64x128xf32> to vector<64x128xf32>
    %c9_24 = arith.constant 9 : index
    %c0_25 = arith.constant 0 : index
    %25 = tpu.strided_load %arg15[%c9_24, %c0_25] {strides = array<i32: 2, 1>} : memref<25x64xf32, #tpu.memory_space<vmem>>, vector<8x64xf32>
    %c10 = arith.constant 10 : index
    %c0_26 = arith.constant 0 : index
    %26 = tpu.strided_load %arg15[%c10, %c0_26] {strides = array<i32: 2, 1>} : memref<25x64xf32, #tpu.memory_space<vmem>>, vector<8x64xf32>
    %cst_27 = arith.constant dense<0.000000e+00> : vector<8x128xf32>
    %27 = tpu.matmul %25, %24, %cst_27 {dimension_numbers = #tpu.dot_dimension_numbers<[1], [0], [0], [1], [0, 0, 1, 1], [], []>} : vector<8x64xf32>, vector<64x128xf32>, vector<8x128xf32> -> vector<8x128xf32>
    %28 = arith.addf %20, %27 : vector<8x128xf32>
    %cst_28 = arith.constant dense<0.000000e+00> : vector<8x128xf32>
    %29 = tpu.matmul %26, %24, %cst_28 {dimension_numbers = #tpu.dot_dimension_numbers<[1], [0], [0], [1], [0, 0, 1, 1], [], []>} : vector<8x64xf32>, vector<64x128xf32>, vector<8x128xf32> -> vector<8x128xf32>
    %30 = arith.addf %22, %29 : vector<8x128xf32>
    %31 = arith.maximumf %28, %30 : vector<8x128xf32>
    %32 = vector.extract_strided_slice %31 {offsets = [0, 0], sizes = [8, 64], strides = [1, 1]} : vector<8x128xf32> to vector<8x64xf32>
    %33 = vector.extract_strided_slice %31 {offsets = [0, 64], sizes = [8, 64], strides = [1, 1]} : vector<8x128xf32> to vector<8x64xf32>
    %34 = arith.maximumf %32, %33 : vector<8x64xf32>
    %c0_29 = arith.constant 0 : index
    %c0_30 = arith.constant 0 : index
    %35 = vector.load %arg3[%c0_29, %c0_30] : memref<1x64xf32, #tpu.memory_space<vmem>>, vector<1x64xf32>
    %36 = vector.broadcast %35 : vector<1x64xf32> to vector<8x64xf32>
    %37 = arith.addf %34, %36 : vector<8x64xf32>
    %cst_31 = arith.constant 0.000000e+00 : f32
    %38 = vector.broadcast %cst_31 : f32 to vector<8x64xf32>
    %39 = arith.maximumf %37, %38 : vector<8x64xf32>
    %cst_32 = arith.constant 0.000000e+00 : f32
    %40 = vector.broadcast %cst_32 : f32 to vector<17x64xf32>
    %c0_33 = arith.constant 0 : index
    %c0_34 = arith.constant 0 : index
    %41 = vector.load %arg16[%c0_33, %c0_34] : memref<17x64xf32, #tpu.memory_space<vmem>>, vector<17x64xf32>
    tpu.vector_store %arg16[%c0_33, %c0_34], %40 {strides = array<i32>} : memref<17x64xf32, #tpu.memory_space<vmem>>, vector<17x64xf32>,
    %c8_35 = arith.constant 8 : index
    %c0_36 = arith.constant 0 : index
    %42 = vector.load %arg16[%c8_35, %c0_36] : memref<17x64xf32, #tpu.memory_space<vmem>>, vector<8x64xf32>
    tpu.vector_store %arg16[%c8_35, %c0_36], %39 {strides = array<i32>} : memref<17x64xf32, #tpu.memory_space<vmem>>, vector<8x64xf32>,
    %cst_37 = arith.constant 0.000000e+00 : f32
    %43 = vector.broadcast %cst_37 : f32 to vector<4x128xf32>
    %cst_38 = arith.constant 0.000000e+00 : f32
    %44 = vector.broadcast %cst_38 : f32 to vector<4x128xf32>
    %c0_39 = arith.constant 0 : index
    %c0_40 = arith.constant 0 : index
    %c0_41 = arith.constant 0 : index
    %45 = vector.load %arg4[%c0_39, %c0_40, %c0_41] : memref<3x64x128xf32, #tpu.memory_space<vmem>>, vector<1x64x128xf32>
    %46 = vector.shape_cast %45 : vector<1x64x128xf32> to vector<64x128xf32>
    %c7_42 = arith.constant 7 : index
    %c0_43 = arith.constant 0 : index
    %47 = tpu.strided_load %arg16[%c7_42, %c0_43] {strides = array<i32: 2, 1>} : memref<17x64xf32, #tpu.memory_space<vmem>>, vector<4x64xf32>
    %c8_44 = arith.constant 8 : index
    %c0_45 = arith.constant 0 : index
    %48 = tpu.strided_load %arg16[%c8_44, %c0_45] {strides = array<i32: 2, 1>} : memref<17x64xf32, #tpu.memory_space<vmem>>, vector<4x64xf32>
    %cst_46 = arith.constant dense<0.000000e+00> : vector<4x128xf32>
    %49 = tpu.matmul %47, %46, %cst_46 {dimension_numbers = #tpu.dot_dimension_numbers<[1], [0], [0], [1], [0, 0, 1, 1], [], []>} : vector<4x64xf32>, vector<64x128xf32>, vector<4x128xf32> -> vector<4x128xf32>
    %50 = arith.addf %43, %49 : vector<4x128xf32>
    %cst_47 = arith.constant dense<0.000000e+00> : vector<4x128xf32>
    %51 = tpu.matmul %48, %46, %cst_47 {dimension_numbers = #tpu.dot_dimension_numbers<[1], [0], [0], [1], [0, 0, 1, 1], [], []>} : vector<4x64xf32>, vector<64x128xf32>, vector<4x128xf32> -> vector<4x128xf32>
    %52 = arith.addf %44, %51 : vector<4x128xf32>
    %c1_48 = arith.constant 1 : index
    %c0_49 = arith.constant 0 : index
    %c0_50 = arith.constant 0 : index
    %53 = vector.load %arg4[%c1_48, %c0_49, %c0_50] : memref<3x64x128xf32, #tpu.memory_space<vmem>>, vector<1x64x128xf32>
    %54 = vector.shape_cast %53 : vector<1x64x128xf32> to vector<64x128xf32>
    %c8_51 = arith.constant 8 : index
    %c0_52 = arith.constant 0 : index
    %55 = tpu.strided_load %arg16[%c8_51, %c0_52] {strides = array<i32: 2, 1>} : memref<17x64xf32, #tpu.memory_space<vmem>>, vector<4x64xf32>
    %c9_53 = arith.constant 9 : index
    %c0_54 = arith.constant 0 : index
    %56 = tpu.strided_load %arg16[%c9_53, %c0_54] {strides = array<i32: 2, 1>} : memref<17x64xf32, #tpu.memory_space<vmem>>, vector<4x64xf32>
    %cst_55 = arith.constant dense<0.000000e+00> : vector<4x128xf32>
    %57 = tpu.matmul %55, %54, %cst_55 {dimension_numbers = #tpu.dot_dimension_numbers<[1], [0], [0], [1], [0, 0, 1, 1], [], []>} : vector<4x64xf32>, vector<64x128xf32>, vector<4x128xf32> -> vector<4x128xf32>
    %58 = arith.addf %50, %57 : vector<4x128xf32>
    %cst_56 = arith.constant dense<0.000000e+00> : vector<4x128xf32>
    %59 = tpu.matmul %56, %54, %cst_56 {dimension_numbers = #tpu.dot_dimension_numbers<[1], [0], [0], [1], [0, 0, 1, 1], [], []>} : vector<4x64xf32>, vector<64x128xf32>, vector<4x128xf32> -> vector<4x128xf32>
    %60 = arith.addf %52, %59 : vector<4x128xf32>
    %c2_57 = arith.constant 2 : index
    %c0_58 = arith.constant 0 : index
    %c0_59 = arith.constant 0 : index
    %61 = vector.load %arg4[%c2_57, %c0_58, %c0_59] : memref<3x64x128xf32, #tpu.memory_space<vmem>>, vector<1x64x128xf32>
    %62 = vector.shape_cast %61 : vector<1x64x128xf32> to vector<64x128xf32>
    %c9_60 = arith.constant 9 : index
    %c0_61 = arith.constant 0 : index
    %63 = tpu.strided_load %arg16[%c9_60, %c0_61] {strides = array<i32: 2, 1>} : memref<17x64xf32, #tpu.memory_space<vmem>>, vector<4x64xf32>
    %c10_62 = arith.constant 10 : index
    %c0_63 = arith.constant 0 : index
    %64 = tpu.strided_load %arg16[%c10_62, %c0_63] {strides = array<i32: 2, 1>} : memref<17x64xf32, #tpu.memory_space<vmem>>, vector<4x64xf32>
    %cst_64 = arith.constant dense<0.000000e+00> : vector<4x128xf32>
    %65 = tpu.matmul %63, %62, %cst_64 {dimension_numbers = #tpu.dot_dimension_numbers<[1], [0], [0], [1], [0, 0, 1, 1], [], []>} : vector<4x64xf32>, vector<64x128xf32>, vector<4x128xf32> -> vector<4x128xf32>
    %66 = arith.addf %58, %65 : vector<4x128xf32>
    %cst_65 = arith.constant dense<0.000000e+00> : vector<4x128xf32>
    %67 = tpu.matmul %64, %62, %cst_65 {dimension_numbers = #tpu.dot_dimension_numbers<[1], [0], [0], [1], [0, 0, 1, 1], [], []>} : vector<4x64xf32>, vector<64x128xf32>, vector<4x128xf32> -> vector<4x128xf32>
    %68 = arith.addf %60, %67 : vector<4x128xf32>
    %69 = arith.maximumf %66, %68 : vector<4x128xf32>
    %70 = vector.extract_strided_slice %69 {offsets = [0, 0], sizes = [4, 64], strides = [1, 1]} : vector<4x128xf32> to vector<4x64xf32>
    %71 = vector.extract_strided_slice %69 {offsets = [0, 64], sizes = [4, 64], strides = [1, 1]} : vector<4x128xf32> to vector<4x64xf32>
    %72 = arith.maximumf %70, %71 : vector<4x64xf32>
    %c0_66 = arith.constant 0 : index
    %c0_67 = arith.constant 0 : index
    %73 = vector.load %arg5[%c0_66, %c0_67] : memref<1x64xf32, #tpu.memory_space<vmem>>, vector<1x64xf32>
    %74 = vector.broadcast %73 : vector<1x64xf32> to vector<4x64xf32>
    %75 = arith.addf %72, %74 : vector<4x64xf32>
    %cst_68 = arith.constant 0.000000e+00 : f32
    %76 = vector.broadcast %cst_68 : f32 to vector<4x64xf32>
    %77 = arith.maximumf %75, %76 : vector<4x64xf32>
    %c0_69 = arith.constant 0 : index
    %c0_70 = arith.constant 0 : index
    %78 = vector.load %arg7[%c0_69, %c0_70] : memref<1x200xf32, #tpu.memory_space<vmem>>, vector<1x200xf32>
    %79 = vector.extract_strided_slice %77 {offsets = [0, 0], sizes = [1, 64], strides = [1, 1]} : vector<4x64xf32> to vector<1x64xf32>
    %c0_71 = arith.constant 0 : index
    %c0_72 = arith.constant 0 : index
    %c0_73 = arith.constant 0 : index
    %80 = vector.load %arg6[%c0_71, %c0_72, %c0_73] : memref<4x64x200xf32, #tpu.memory_space<vmem>>, vector<1x64x200xf32>
    %81 = vector.shape_cast %80 : vector<1x64x200xf32> to vector<64x200xf32>
    %cst_74 = arith.constant dense<0.000000e+00> : vector<1x200xf32>
    %82 = tpu.matmul %79, %81, %cst_74 {dimension_numbers = #tpu.dot_dimension_numbers<[1], [0], [0], [1], [0, 0, 1, 1], [], []>} : vector<1x64xf32>, vector<64x200xf32>, vector<1x200xf32> -> vector<1x200xf32>
    %83 = arith.addf %78, %82 : vector<1x200xf32>
    %84 = vector.extract_strided_slice %77 {offsets = [1, 0], sizes = [1, 64], strides = [1, 1]} : vector<4x64xf32> to vector<1x64xf32>
    %c1_75 = arith.constant 1 : index
    %c0_76 = arith.constant 0 : index
    %c0_77 = arith.constant 0 : index
    %85 = vector.load %arg6[%c1_75, %c0_76, %c0_77] : memref<4x64x200xf32, #tpu.memory_space<vmem>>, vector<1x64x200xf32>
    %86 = vector.shape_cast %85 : vector<1x64x200xf32> to vector<64x200xf32>
    %cst_78 = arith.constant dense<0.000000e+00> : vector<1x200xf32>
    %87 = tpu.matmul %84, %86, %cst_78 {dimension_numbers = #tpu.dot_dimension_numbers<[1], [0], [0], [1], [0, 0, 1, 1], [], []>} : vector<1x64xf32>, vector<64x200xf32>, vector<1x200xf32> -> vector<1x200xf32>
    %88 = arith.addf %83, %87 : vector<1x200xf32>
    %89 = vector.extract_strided_slice %77 {offsets = [2, 0], sizes = [1, 64], strides = [1, 1]} : vector<4x64xf32> to vector<1x64xf32>
    %c2_79 = arith.constant 2 : index
    %c0_80 = arith.constant 0 : index
    %c0_81 = arith.constant 0 : index
    %90 = vector.load %arg6[%c2_79, %c0_80, %c0_81] : memref<4x64x200xf32, #tpu.memory_space<vmem>>, vector<1x64x200xf32>
    %91 = vector.shape_cast %90 : vector<1x64x200xf32> to vector<64x200xf32>
    %cst_82 = arith.constant dense<0.000000e+00> : vector<1x200xf32>
    %92 = tpu.matmul %89, %91, %cst_82 {dimension_numbers = #tpu.dot_dimension_numbers<[1], [0], [0], [1], [0, 0, 1, 1], [], []>} : vector<1x64xf32>, vector<64x200xf32>, vector<1x200xf32> -> vector<1x200xf32>
    %93 = arith.addf %88, %92 : vector<1x200xf32>
    %94 = vector.extract_strided_slice %77 {offsets = [3, 0], sizes = [1, 64], strides = [1, 1]} : vector<4x64xf32> to vector<1x64xf32>
    %c3 = arith.constant 3 : index
    %c0_83 = arith.constant 0 : index
    %c0_84 = arith.constant 0 : index
    %95 = vector.load %arg6[%c3, %c0_83, %c0_84] : memref<4x64x200xf32, #tpu.memory_space<vmem>>, vector<1x64x200xf32>
    %96 = vector.shape_cast %95 : vector<1x64x200xf32> to vector<64x200xf32>
    %cst_85 = arith.constant dense<0.000000e+00> : vector<1x200xf32>
    %97 = tpu.matmul %94, %96, %cst_85 {dimension_numbers = #tpu.dot_dimension_numbers<[1], [0], [0], [1], [0, 0, 1, 1], [], []>} : vector<1x64xf32>, vector<64x200xf32>, vector<1x200xf32> -> vector<1x200xf32>
    %98 = arith.addf %93, %97 : vector<1x200xf32>
    %cst_86 = arith.constant 0.000000e+00 : f32
    %99 = vector.broadcast %cst_86 : f32 to vector<1x200xf32>
    %100 = arith.cmpf oge, %98, %99 : vector<1x200xf32>
    %cst_87 = arith.constant 0.00999999977 : f32
    %101 = vector.broadcast %cst_87 : f32 to vector<1x200xf32>
    %102 = arith.mulf %101, %98 : vector<1x200xf32>
    %103 = arith.select %100, %98, %102 : vector<1x200xi1>, vector<1x200xf32>
    %c0_88 = arith.constant 0 : index
    %c0_89 = arith.constant 0 : index
    %104 = vector.load %arg8[%c0_88, %c0_89] : memref<200x10xf32, #tpu.memory_space<vmem>>, vector<200x10xf32>
    %cst_90 = arith.constant dense<0.000000e+00> : vector<1x10xf32>
    %105 = tpu.matmul %103, %104, %cst_90 {dimension_numbers = #tpu.dot_dimension_numbers<[1], [0], [0], [1], [0, 0, 1, 1], [], []>} : vector<1x200xf32>, vector<200x10xf32>, vector<1x10xf32> -> vector<1x10xf32>
    %c0_91 = arith.constant 0 : index
    %c0_92 = arith.constant 0 : index
    %106 = vector.load %arg9[%c0_91, %c0_92] : memref<1x10xf32, #tpu.memory_space<vmem>>, vector<1x10xf32>
    %107 = arith.addf %105, %106 : vector<1x10xf32>
    %cst_93 = arith.constant 0.000000e+00 : f32
    %108 = vector.broadcast %cst_93 : f32 to vector<1x10xf32>
    %109 = arith.cmpf oge, %107, %108 : vector<1x10xf32>
    %cst_94 = arith.constant 0.00999999977 : f32
    %110 = vector.broadcast %cst_94 : f32 to vector<1x10xf32>
    %111 = arith.mulf %110, %107 : vector<1x10xf32>
    %112 = arith.select %109, %107, %111 : vector<1x10xi1>, vector<1x10xf32>
    %cst_95 = arith.constant dense<0xFF800000> : vector<1xf32>
    %113 = vector.multi_reduction <maximumf>, %112, %cst_95 [1] : vector<1x10xf32> to vector<1xf32>
    %114 = vector.shape_cast %113 : vector<1xf32> to vector<1x1xf32>
    %115 = vector.broadcast %114 : vector<1x1xf32> to vector<1x10xf32>
    %116 = arith.subf %112, %115 : vector<1x10xf32>
    %117 = math.exp %116 : vector<1x10xf32>
    %cst_96 = arith.constant dense<0.000000e+00> : vector<1xf32>
    %118 = vector.multi_reduction <add>, %117, %cst_96 [1] : vector<1x10xf32> to vector<1xf32>
    %119 = vector.shape_cast %118 : vector<1xf32> to vector<1x1xf32>
    %120 = vector.broadcast %119 : vector<1x1xf32> to vector<1x10xf32>
    %121 = arith.divf %117, %120 : vector<1x10xf32>
    %cst_97 = arith.constant dense<0.000000e+00> : vector<1xf32>
    %122 = vector.multi_reduction <add>, %112, %cst_97 [1] : vector<1x10xf32> to vector<1xf32>
    %123 = vector.shape_cast %122 : vector<1xf32> to vector<1x1xf32>
    %cst_98 = arith.constant 0.00999999977 : f32
    %124 = vector.broadcast %cst_98 : f32 to vector<1x10xf32>
    %125 = arith.mulf %112, %124 : vector<1x10xf32>
    %126 = vector.broadcast %123 : vector<1x1xf32> to vector<1x10xf32>
    %127 = arith.mulf %126, %121 : vector<1x10xf32>
    %cst_99 = arith.constant 9.900000e-01 : f32
    %128 = vector.broadcast %cst_99 : f32 to vector<1x10xf32>
    %129 = arith.mulf %127, %128 : vector<1x10xf32>
    %130 = arith.addf %125, %129 : vector<1x10xf32>
    %c0_100 = arith.constant 0 : index
    %c0_101 = arith.constant 0 : index
    %131 = vector.load %arg12[%c0_100, %c0_101] : memref<1x10xf32, #tpu.memory_space<vmem>>, vector<1x10xf32>
    %132 = arith.mulf %130, %131 : vector<1x10xf32>
    %c0_102 = arith.constant 0 : index
    %c0_103 = arith.constant 0 : index
    %133 = vector.load %arg13[%c0_102, %c0_103] : memref<1x10xf32, #tpu.memory_space<vmem>>, vector<1x10xf32>
    %134 = arith.addf %132, %133 : vector<1x10xf32>
    %c0_104 = arith.constant 0 : index
    %c0_105 = arith.constant 0 : index
    %135 = vector.load %arg10[%c0_104, %c0_105] : memref<10x1xf32, #tpu.memory_space<vmem>>, vector<10x1xf32>
    %cst_106 = arith.constant dense<0.000000e+00> : vector<1x1xf32>
    %136 = tpu.matmul %134, %135, %cst_106 {dimension_numbers = #tpu.dot_dimension_numbers<[1], [0], [0], [1], [0, 0, 1, 1], [], []>} : vector<1x10xf32>, vector<10x1xf32>, vector<1x1xf32> -> vector<1x1xf32>
    %c0_107 = arith.constant 0 : index
    %c0_108 = arith.constant 0 : index
    %137 = vector.load %arg11[%c0_107, %c0_108] : memref<1x1xf32, #tpu.memory_space<vmem>>, vector<1x1xf32>
    %138 = arith.addf %136, %137 : vector<1x1xf32>
    %c0_109 = arith.constant 0 : index
    %c0_110 = arith.constant 0 : index
    %c0_111 = arith.constant 0 : index
    %139 = vector.load %arg14[%c0_109, %c0_110, %c0_111] : memref<1x1x1xf32, #tpu.memory_space<vmem>>, vector<1x1x1xf32>
    %140 = vector.shape_cast %139 : vector<1x1x1xf32> to vector<1x1xf32>
    %141 = vector.shape_cast %138 : vector<1x1xf32> to vector<1x1x1xf32>
    tpu.vector_store %arg14[%c0_109, %c0_110, %c0_111], %141 {strides = array<i32>} : memref<1x1x1xf32, #tpu.memory_space<vmem>>, vector<1x1x1xf32>,
    return
  }
  func.func @transform_0(%arg0: i32) -> (i32, i32, i32) {
    %c0_i32 = arith.constant 0 : i32
    %c0_i32_0 = arith.constant 0 : i32
    %c0_i32_1 = arith.constant 0 : i32
    return %arg0, %c0_i32, %c0_i32_0 : i32, i32, i32
  }
  func.func @transform_1(%arg0: i32) -> (i32, i32, i32) {
    %c0_i32 = arith.constant 0 : i32
    %c0_i32_0 = arith.constant 0 : i32
    %c0_i32_1 = arith.constant 0 : i32
    %c0_i32_2 = arith.constant 0 : i32
    return %c0_i32, %c0_i32_0, %c0_i32_1 : i32, i32, i32
  }
  func.func @transform_2(%arg0: i32) -> (i32, i32) {
    %c0_i32 = arith.constant 0 : i32
    %c0_i32_0 = arith.constant 0 : i32
    %c0_i32_1 = arith.constant 0 : i32
    return %c0_i32, %c0_i32_0 : i32, i32
  }
  func.func @transform_3(%arg0: i32) -> (i32, i32, i32) {
    %c0_i32 = arith.constant 0 : i32
    %c0_i32_0 = arith.constant 0 : i32
    %c0_i32_1 = arith.constant 0 : i32
    %c0_i32_2 = arith.constant 0 : i32
    return %c0_i32, %c0_i32_0, %c0_i32_1 : i32, i32, i32
  }
  func.func @transform_4(%arg0: i32) -> (i32, i32) {
    %c0_i32 = arith.constant 0 : i32
    %c0_i32_0 = arith.constant 0 : i32
    %c0_i32_1 = arith.constant 0 : i32
    return %c0_i32, %c0_i32_0 : i32, i32
  }
  func.func @transform_5(%arg0: i32) -> (i32, i32, i32) {
    %c0_i32 = arith.constant 0 : i32
    %c0_i32_0 = arith.constant 0 : i32
    %c0_i32_1 = arith.constant 0 : i32
    %c0_i32_2 = arith.constant 0 : i32
    return %c0_i32, %c0_i32_0, %c0_i32_1 : i32, i32, i32
  }
  func.func @transform_6(%arg0: i32) -> (i32, i32) {
    %c0_i32 = arith.constant 0 : i32
    %c0_i32_0 = arith.constant 0 : i32
    %c0_i32_1 = arith.constant 0 : i32
    return %c0_i32, %c0_i32_0 : i32, i32
  }
  func.func @transform_7(%arg0: i32) -> (i32, i32) {
    %c0_i32 = arith.constant 0 : i32
    %c0_i32_0 = arith.constant 0 : i32
    %c0_i32_1 = arith.constant 0 : i32
    return %c0_i32, %c0_i32_0 : i32, i32
  }
  func.func @transform_8(%arg0: i32) -> (i32, i32) {
    %c0_i32 = arith.constant 0 : i32
    %c0_i32_0 = arith.constant 0 : i32
    %c0_i32_1 = arith.constant 0 : i32
    return %c0_i32, %c0_i32_0 : i32, i32
  }
  func.func @transform_9(%arg0: i32) -> (i32, i32) {
    %c0_i32 = arith.constant 0 : i32
    %c0_i32_0 = arith.constant 0 : i32
    %c0_i32_1 = arith.constant 0 : i32
    return %c0_i32, %c0_i32_0 : i32, i32
  }
  func.func @transform_10(%arg0: i32) -> (i32, i32) {
    %c0_i32 = arith.constant 0 : i32
    %c0_i32_0 = arith.constant 0 : i32
    %c0_i32_1 = arith.constant 0 : i32
    return %c0_i32, %c0_i32_0 : i32, i32
  }
  func.func @transform_11(%arg0: i32) -> (i32, i32) {
    %c0_i32 = arith.constant 0 : i32
    %c0_i32_0 = arith.constant 0 : i32
    %c0_i32_1 = arith.constant 0 : i32
    return %c0_i32, %c0_i32_0 : i32, i32
  }
  func.func @transform_12(%arg0: i32) -> (i32, i32) {
    %c0_i32 = arith.constant 0 : i32
    %c0_i32_0 = arith.constant 0 : i32
    %c0_i32_1 = arith.constant 0 : i32
    return %c0_i32, %c0_i32_0 : i32, i32
  }
  func.func @transform_13(%arg0: i32) -> (i32, i32, i32) {
    %c0_i32 = arith.constant 0 : i32
    %c0_i32_0 = arith.constant 0 : i32
    %c0_i32_1 = arith.constant 0 : i32
    return %arg0, %c0_i32, %c0_i32_0 : i32, i32, i32
  }
}

</mosaic_0001>

<bundles_post_ra>
// kernel: tpu_custom_call.1
= control target key start
LH: loop header
LB: loop body
LE: loop exit
PB: predicated region body
PF: predicated region fallthrough
CT: control target
= control target key end

     0   :  { %s3446_s0 = inlined_call_operand.vmem [shape: f32[2,16,64], index: 0, kind: input, shape index: {}]   ;;  %s3447_s1 = inlined_call_operand.vmem [shape: f32[3,64,128], index: 1, kind: input, shape index: {}]   ;;  %s3448_s2 = inlined_call_operand.vmem [shape: f32[1,64], index: 2, kind: input, shape index: {}]   ;;  %s3449_s3 = inlined_call_operand.hbm [shape: f32[3,64,128], index: 3, kind: input, shape index: {}]   ;;  %s3450_s4 = inlined_call_operand.vmem [shape: f32[1,64], index: 4, kind: input, shape index: {}]   ;;  %s3451_s5 = inlined_call_operand.hbm [shape: f32[4,64,200], index: 5, kind: input, shape index: {}]   ;;  %s3452_s6 = inlined_call_operand.vmem [shape: f32[1,200], index: 6, kind: input, shape index: {}]   ;;  %s3453_s7 = inlined_call_operand.vmem [shape: f32[200,10], index: 7, kind: input, shape index: {}]   ;;  %s3454_s8 = inlined_call_operand.vmem [shape: f32[1,10], index: 8, kind: input, shape index: {}]   ;;  %s3455_s9 = inlined_call_operand.vmem [shape: f32[10,1], index: 9, kind: input, shape index: {}]   ;;  %s3456_s10 = inlined_call_operand.<no memory space> [shape: f32[1,1], index: 10, kind: input, shape index: {}]   ;;  %s3457_s11 = inlined_call_operand.vmem [shape: f32[1,10], index: 11, kind: input, shape index: {}]   ;;  %s3458_s12 = inlined_call_operand.vmem [shape: f32[1,10], index: 12, kind: input, shape index: {}]   ;;  %s3459_s13 = inlined_call_operand.vmem [shape: f32[2,1,1], index: 13, kind: output, shape index: {}]  }
   0x1   :  { %v18_v0 = vstv %s3456_s10 }
   0x2   :  { %19 = vst [vmem:[#allocation4] sm:$0x1] %v18_v0 }
   0x3   :  { %20 = vsyncpa [#allocation6], 0 }
   0x4   :  { %21 = vsyncpa [#allocation8], 0  ;;  %s3039_s27 = smov 0  }
   0x5 LB: > { %s2954_s28 = smov [#allocation5]   ;;  %s3045_s30 = sadd.s32 4294967295, %s2952_s27   ;;  %s2952_s27 = sphi %s3039_s27, %s27_s27  }
   0x6   : > { %s354_s29 = sshll.u32 %s2954_s28, 4  ;;  %p2181_p0 = scmp.ge.s32.totalorder %s2952_s27, 1  ;;  %s355_s29 = int_to_ptr.vmem [resolvable:$true] %s354_s29 }
   0x7   : > { %p336_p1 = scmp.lt.s32.totalorder %s2952_s27, 3  ;;  %p3460_p3 = scmp.eq.s32.totalorder %s3045_s30, 0 }
   0x8   : > { %s2955_s14 = smov [#allocation7]   ;;  %s2882_s19 = scalar_lea.hbm %s3449_s3, 3072 }
   0x9   : > { %p3049_p2 = pnand %p2181_p0, %p336_p1  ;;  %s370_s15 = sshll.u32 %s2955_s14, 4  ;;  %s3062_s15 = int_to_ptr.vmem [resolvable:$true] %s370_s15 }
   0xa   : > { %p2883_p6 = scmp.ne.s32.totalorder %s3449_s3, %s2882_s19  ;;  %p2889_p10 = scmp.lt.u32.totalorder %s2882_s19, %s3449_s3 }
   0xb   : > { %s3462_s10 = scalar_select %p3049_p2, 1, 0 }
   0xc   : > { %p2847_p4 = pneg %p3049_p2 }
   0xe   : > { %p3058_p5 = pnand %p3460_p3, %p2847_p4 }
  0x10   : > { %p2884_p7 = pneg %p3058_p5 }
  0x12   : > { %p2885_p8 = pnand %p2884_p7, %p2883_p6 }
  0x14   : > { %p2886_p9 = pneg %p2885_p8 }
  0x16   : > { %p2891_p11 = pnand %p2889_p10, %p2886_p9 }
  0x18   : > { %2894 = shalt.err (!%p2891_p11)
}
  0x19   : > { %s2895_s24 = scalar_lea.vmem %s355_s29, 3072  ;;  %p2903_p1 = scmp.lt.s32.totalorder %s355_s29, %s355_s29 }
  0x1a   : > { %p2896_p12 = scmp.ne.s32.totalorder %s355_s29, %s2895_s24  ;;  %p2904_p4 = scmp.lt.s32.totalorder %s2895_s24, %s2895_s24 }
  0x1c   : > { %p2898_p13 = pnand %p2896_p12, %p2884_p7  ;;  %p2905_p3 = por %p2904_p4, %p2903_p1 }
  0x1e   : > { %p2899_p0 = pneg %p2898_p13 }
  0x20   : > { %p2906_p2 = pnand %p2905_p3, %p2899_p0 }
  0x22   : > { %2909 = shalt.err (!%p2906_p2)
}
  0x23   : > { %s2956_s25 = smov 128   ;;  %s2957_s26 = smov 8  }
  0x24   : > { %2850 = dma.hbm_to_vmem [thread:$0]  (!%p3058_p5), %s3449_s3, 3072, %s355_s29, [#allocation6], %s2956_s25, %s2956_s25, %s2957_s26  }
  0x25   : > { %s2910_s19 = scalar_lea.hbm %s3451_s5, 8192 }
  0x26   : > { %p2911_p6 = scmp.ne.s32.totalorder %s3451_s5, %s2910_s19  ;;  %p2917_p8 = scmp.lt.u32.totalorder %s2910_s19, %s3451_s5 }
  0x28   : > { %p2913_p2 = pnand %p2911_p6, %p2884_p7 }
  0x2a   : > { %p2914_p3 = pneg %p2913_p2 }
  0x2c   : > { %p2919_p9 = pnand %p2917_p8, %p2914_p3 }
  0x2e   : > { %2922 = shalt.err (!%p2919_p9)
}
  0x2f   : > { %s2923_s29 = scalar_lea.vmem %s3062_s15, 8192  ;;  %p2931_p13 = scmp.lt.s32.totalorder %s3062_s15, %s3062_s15 }
  0x30   : > { %p2924_p10 = scmp.ne.s32.totalorder %s3062_s15, %s2923_s29  ;;  %p2932_p0 = scmp.lt.s32.totalorder %s2923_s29, %s2923_s29 }
  0x32   : > { %p2926_p11 = pnand %p2924_p10, %p2884_p7  ;;  %p2933_p1 = por %p2932_p0, %p2931_p13 }
  0x34   : > { %p2927_p12 = pneg %p2926_p11 }
  0x36   : > { %p2934_p4 = pnand %p2933_p1, %p2927_p12 }
  0x38   : > { %2937 = shalt.err (!%p2934_p4)
}
  0x39   : > { %s2958_s24 = smov 256   ;;  %s2959_s25 = smov 16  }
  0x3a   : > { %2853 = dma.hbm_to_vmem [thread:$0]  (!%p3058_p5), %s3451_s5, 8192, %s3062_s15, [#allocation8], %s2958_s24, %s2958_s24, %s2959_s25  }
  0x3b   : > { %p3464_p6 = scmp.ne.s32.totalorder %s3462_s10, 0 }
  0x3c   : > { %p3465_p7 = scmp.eq.s32.totalorder (!%p3464_p6), %s3045_s30, 0 }
  0x3d   : > { %415 = sbr.rel (%p3464_p6) target bundleno = 1851 (0x73b), region = 72 }
  0x44   : > { %2943 = dma.done.wait (%p3465_p7), [#allocation6], 3072   ;;  %p3466_p2 = pmov %p3465_p7 }
  0x46   : > { %2945 = vsyncadd (%p3466_p2), [#allocation6], 4294964224  ;;  %p3467_p3 = pmov %p3466_p2 }
  0x47   : > { %p3468_p8 = pmov %p3466_p2 }
  0x48   : > { %2947 = dma.done.wait (%p3467_p3), [#allocation8], 8192  }
  0x49   : > { %2949 = vsyncadd (%p3468_p8), [#allocation8], 4294959104  ;;  %p461_p9 = scmp.lt.s32.totalorder %s3045_s30, 1  ;;  %v2960_v1 = vmov 0.0|0.0   ;;  %vm471_vm0 = vcmask 523264   ;;  %vm475_vm1 = vcmask 516096  }
  0x4a   : > { %2576 = vmatprep.subr.bf16.mxu1 %v2960_v1  ;;  %2588 = vmatprep.subr.bf16.mxu0 %v2960_v1  ;;  %vm2961_vm2 = vmmov 0   ;;  %v2962_v2 = vmov 0.0   ;;  %v2190_v3 = vld [vmem:[%s3447_s1 + $0x40] sm:$0xff]  ;;  %v2191_v4 = vld [vmem:[%s3447_s1 + $0x48] sm:$0xff]  ;;  %v2192_v8 = vld [vmem:[%s3447_s1 + $0x50] sm:$0xff]  ;;  %s2963_s18 = smov 64  }
  0x4b   : > { %2357 = vmatprep.mubr.msk.f32.mxu1 %vm2961_vm2, %v2962_v2  ;;  %s3470_s30 = smov (!%p461_p9, %s3045_s30), 1  ;;  %473 = vst.msk [vmem:[#allocation2 + $0x8] sm:$0xff] %vm471_vm0, %v2962_v2  ;;  %474 = vst.msk [vmem:[#allocation2 + $0x10] sm:$0xff] %vm471_vm0, %v2962_v2  ;;  %2376 = vmatprep.mubr.msk.f32.mxu0 %vm2961_vm2, %v2962_v2  ;;  %v479_v5 = vld [vmem:[%s3447_s1] sm:$0xff]  ;;  %v2577_v6 = vpack.c.bf16 %v2191_v4, %v2190_v3  ;;  %v480_v7 = vld [vmem:[%s3447_s1 + $0x8] sm:$0xff]  ;;  %vm1928_vm4 = vcmask 588800  }
  0x4c   : > { %472 = vst.msk [vmem:[#allocation2] sm:$0xff] %vm471_vm0, %v2962_v2  ;;  %962 = vst.msk [vmem:[#allocation3] sm:$0xff] %vm471_vm0, %v2962_v2  ;;  %s2229_s10 = sshll.u32 %s3470_s30, 4  ;;  %v2193_v9 = vld [vmem:[%s3447_s1 + $0x58] sm:$0xff]  ;;  %v3162_v10 = vpack.c.bf16 %v480_v7, %v479_v5  ;;  %v481_v11 = vld [vmem:[%s3447_s1 + $0x10] sm:$0xff]  ;;  %vm2004_vm6 = vcmask 73728   ;;  %s468_s23 = scalar_lea.vmem %s3459_s13, %s3470_s30 }
  0x4d   : > { %963 = vst.msk [vmem:[#allocation3 + $0x8] sm:$0xff] %vm471_vm0, %v2962_v2  ;;  %v482_v12 = vld [vmem:[%s3447_s1 + $0x18] sm:$0xff]  ;;  %s465_s17 = scalar_lea.vmem %s3446_s0, %s2229_s10  ;;  %2578 = vmatpush3.bf16.msra.mxu1 %v2577_v6  ;;  %v2580_v13 = vpack.c.bf16 %v2193_v9, %v2192_v8  ;;  %v2194_v15 = vld [vmem:[%s3447_s1 + $0x60] sm:$0xff]  ;;  %v2195_v16 = vld [vmem:[%s3447_s1 + $0x68] sm:$0xff]  ;;  %vm2034_vm7 = vcmask 1041408   ;;  %vm2965_vm8 = vmmov 1  }
  0x4e   : > { %476 = vst.msk [vmem:[#allocation2 + $0x18] sm:$0x1] %vm475_vm1, %v2962_v2  ;;  %964 = vst.msk [vmem:[#allocation3 + $0x10] sm:$0x1] %vm475_vm1, %v2962_v2  ;;  %2590 = vmatpush3.bf16.msra.mxu0 %v3162_v10  ;;  %2579 = vmatprep.subr.bf16.mxu1 %v2960_v1  ;;  %v3175_v14 = vpack.c.bf16 %v482_v12, %v481_v11  ;;  %v483_v17 = vld [vmem:[%s3447_s1 + $0x20] sm:$0xff]  ;;  %v484_v18 = vld [vmem:[%s3447_s1 + $0x28] sm:$0xff]  ;;  %v2583_v21 = vpack.c.bf16 %v2195_v16, %v2194_v15 }
  0x4f   : > { %2591 = vmatprep.subr.bf16.mxu0 %v2960_v1  ;;  %v469_v19 = vld [vmem:[%s465_s17] sm:$0xff]  ;;  %v470_v20 = vld [vmem:[%s465_s17 + $0x8] sm:$0xff]  ;;  %v2595_v22 = vpack.c.bf16 %v484_v18, %v483_v17  ;;  %v2196_v23 = vld [vmem:[%s3447_s1 + $0x70] sm:$0xff]  ;;  %vm2030_vm10 = vcmask 80896   ;;  %vm2108_vm11 = vcmask 0  }
  0x50   : > { %477 = vst.msk [vmem:[#allocation2 + $0x8] sm:$0xff] %vm471_vm0, %v469_v19  ;;  %478 = vst.msk [vmem:[#allocation2 + $0x10] sm:$0xff] %vm471_vm0, %v470_v20  ;;  %v2197_v24 = vld [vmem:[%s3447_s1 + $0x78] sm:$0xff]  ;;  %v485_v25 = vld [vmem:[%s3447_s1 + $0x30] sm:$0xff] }
  0x51   : > { %2581 = vmatpush3.bf16.msra.mxu1 %v2580_v13  ;;  %v486_v26 = vld [vmem:[%s3447_s1 + $0x38] sm:$0xff]  ;;  %v2586_v27 = vpack.c.bf16 %v2197_v24, %v2196_v23  ;;  %v2202_v29 = vld [vmem:[%s3447_s1 + $0x80] sm:$0xff]  ;;  %v2203_v30 = vld [vmem:[%s3447_s1 + $0x88] sm:$0xff] }
  0x52   : > { %2593 = vmatpush3.bf16.msra.mxu0 %v3175_v14  ;;  %2582 = vmatprep.subr.bf16.mxu1 %v2960_v1  ;;  %v2598_v28 = vpack.c.bf16 %v486_v26, %v485_v25  ;;  %v2625_v33 = vpack.c.bf16 %v2203_v30, %v2202_v29  ;;  %v2204_v34 = vld [vmem:[%s3447_s1 + $0x90] sm:$0xff]  ;;  %v2205_v35 = vld [vmem:[%s3447_s1 + $0x98] sm:$0xff]  ;;  %v2206_v37 = vld [vmem:[%s3447_s1 + $0xa0] sm:$0xff] }
  0x53   : > { %2594 = vmatprep.subr.bf16.mxu0 %v2960_v1  ;;  %v2628_v36 = vpack.c.bf16 %v2205_v35, %v2204_v34  ;;  %v2207_v38 = vld [vmem:[%s3447_s1 + $0xa8] sm:$0xff]  ;;  %v2208_v40 = vld [vmem:[%s3447_s1 + $0xb0] sm:$0xff]  ;;  %v2209_v41 = vld [vmem:[%s3447_s1 + $0xb8] sm:$0xff] }
  0x54   : > { %v2631_v39 = vpack.c.bf16 %v2207_v38, %v2206_v37  ;;  %v2634_v42 = vpack.c.bf16 %v2209_v41, %v2208_v40  ;;  %v979_v45 = vld [vmem:[#allocation5 + $0x40] sm:$0xff]  ;;  %v980_v46 = vld [vmem:[#allocation5 + $0x48] sm:$0xff]  ;;  %v981_v53 = vld [vmem:[#allocation5 + $0x50] sm:$0xff] }
  0x55   : > { %2584 = vmatpush3.bf16.msra.mxu1 %v2583_v21  ;;  %v2649_v47 = vpack.c.bf16 %v980_v46, %v979_v45  ;;  %v982_v54 = vld [vmem:[#allocation5 + $0x58] sm:$0xff]  ;;  %v983_v56 = vld [vmem:[#allocation5 + $0x60] sm:$0xff]  ;;  %v984_v57 = vld [vmem:[#allocation5 + $0x68] sm:$0xff] }
  0x56   : > { %2596 = vmatpush3.bf16.msra.mxu0 %v2595_v22  ;;  %2585 = vmatprep.subr.bf16.mxu1 %v2960_v1  ;;  %v2652_v55 = vpack.c.bf16 %v982_v54, %v981_v53  ;;  %v2655_v58 = vpack.c.bf16 %v984_v57, %v983_v56  ;;  %v985_v59 = vld [vmem:[#allocation5 + $0x70] sm:$0xff]  ;;  %v986_v60 = vld [vmem:[#allocation5 + $0x78] sm:$0xff]  ;;  %v2212_v3 = vld [vmem:[%s3448_s2] ss:$0 sm:$0xff] }
  0x57   : > { %2597 = vmatprep.subr.bf16.mxu0 %v2960_v1  ;;  %v490_v31 = vld [vmem:[#allocation2 + $0x8] ss:$2 sm:$0xff]  ;;  %v488_v32 = vld [vmem:[#allocation2 + $0x7] ss:$2 sm:$0xff]  ;;  %v2658_v61 = vpack.c.bf16 %v986_v60, %v985_v59  ;;  %v966_v8 = vld [vmem:[#allocation5] sm:$0xff] }
  0x58   : > { %v501_v43 = vld [vmem:[#allocation2 + $0x9] ss:$2 sm:$0xff]  ;;  %v801_v44 = vld [vmem:[#allocation2 + $0xa] ss:$2 sm:$0xff]  ;;  %v967_v9 = vld [vmem:[#allocation5 + $0x8] sm:$0xff] }
  0x59   : > { %2587 = vmatpush3.bf16.msra.mxu1 %v2586_v27  ;;  %v968_v11 = vld [vmem:[#allocation5 + $0x10] sm:$0xff]  ;;  %v969_v12 = vld [vmem:[#allocation5 + $0x18] sm:$0xff]  ;;  %v970_v16 = vld [vmem:[#allocation5 + $0x20] sm:$0xff] }
  0x5a   : > { %2599 = vmatpush3.bf16.msra.mxu0 %v2598_v28  ;;  %2600 = vmatprep.subr.bf16.mxu1 %v2960_v1  ;;  %v2664_v15 = vpack.c.bf16 %v969_v12, %v968_v11  ;;  %v971_v17 = vld [vmem:[#allocation5 + $0x28] sm:$0xff]  ;;  %v972_v19 = vld [vmem:[#allocation5 + $0x30] sm:$0xff]  ;;  %v973_v20 = vld [vmem:[#allocation5 + $0x38] sm:$0xff] }
  0x5b   : > { %2624 = vmatprep.subr.bf16.mxu0 %v2960_v1  ;;  %v2667_v18 = vpack.c.bf16 %v971_v17, %v970_v16  ;;  %v1280_v23 = vld [vmem:[#allocation5 + $0x88] sm:$0xff]  ;;  %v1281_v25 = vld [vmem:[#allocation5 + $0x90] sm:$0xff]  ;;  %v1282_v26 = vld [vmem:[#allocation5 + $0x98] sm:$0xff] }
  0x5c   : > { %2358 = vmatmul.mubr.msk.f32.vlgmr.msra.gmra.mrb[0].mxu1 %vm471_vm0, %v490_v31  ;;  %v1283_v29 = vld [vmem:[#allocation5 + $0xa0] sm:$0xff]  ;;  %v1284_v30 = vld [vmem:[#allocation5 + $0xa8] sm:$0xff]  ;;  %v1453_v37 = vld [vmem:[#allocation7 + $0x18] sm:$0xff] }
  0x5d   : > { %2377 = vmatmul.mubr.msk.f32.vlgmr.msra.gmra.mrb[0].mxu0 %vm471_vm0, %v488_v32  ;;  %2602 = vmatpush3.bf16.msra.mxu1 %v2577_v6  ;;  %v1285_v32 = vld [vmem:[#allocation5 + $0xb0] sm:$0xff]  ;;  %v1450_v38 = vld [vmem:[#allocation7] sm:$0xff]  ;;  %v1561_v41 = vld [vmem:[#allocation7 + $0x88] sm:$0xff] }
  0x5e   : > { %2626 = vmatpush3.bf16.msra.mxu0 %v2625_v33  ;;  %2603 = vmatprep.subr.bf16.mxu1 %v2960_v1  ;;  %v1452_v40 = vld [vmem:[#allocation7 + $0x10] sm:$0xff]  ;;  %v1560_v45 = vld [vmem:[#allocation7 + $0x80] sm:$0xff]  ;;  %v1565_v54 = vld [vmem:[#allocation7 + $0xa8] sm:$0xff] }
  0x5f   : > { %2627 = vmatprep.subr.bf16.mxu0 %v2960_v1  ;;  %2433 = vmatprep.mubr.msk.f32.mxu0 %vm2961_vm2, %v2962_v2  ;;  %v1562_v46 = vld [vmem:[#allocation7 + $0x90] sm:$0xff]  ;;  %v1564_v56 = vld [vmem:[#allocation7 + $0xa0] sm:$0xff]  ;;  %v1459_v59 = vld [vmem:[#allocation7 + $0x48] sm:$0xff] }
  0x60   : > { %2395 = vmatprep.mubr.msk.f32.mxu1 %vm2961_vm2, %v2962_v2  ;;  %v1461_v60 = vld [vmem:[#allocation7 + $0x58] sm:$0xff]  ;;  %v1573_v16 = vld [vmem:[#allocation7 + $0xe8] sm:$0xff]  ;;  %vm2822_vm9 = vmpackc.low %vm2034_vm7, %vm2965_vm8 }
  0x61   : > { %2605 = vmatpush3.bf16.msra.mxu1 %v2580_v13  ;;  %v1465_v11 = vld [vmem:[#allocation7 + $0x78] sm:$0xff] }
  0x62   : > { %2629 = vmatpush3.bf16.msra.mxu0 %v2628_v36  ;;  %2606 = vmatprep.subr.bf16.mxu1 %v2960_v1  ;;  %v1575_v17 = vld [vmem:[#allocation7 + $0xf8] sm:$0xff] }
  0x63   : > { %2630 = vmatprep.subr.bf16.mxu0 %v2960_v1 }
  0x65   : > { %2608 = vmatpush3.bf16.msra.mxu1 %v2583_v21  ;;  %v2670_v21 = vpack.c.bf16 %v973_v20, %v972_v19  ;;  %v1572_v19 = vld [vmem:[#allocation7 + $0xe0] sm:$0xff]  ;;  %v1574_v20 = vld [vmem:[#allocation7 + $0xf0] sm:$0xff] }
  0x66   : > { %2632 = vmatpush3.bf16.msra.mxu0 %v2631_v39  ;;  %2609 = vmatprep.subr.bf16.mxu1 %v2960_v1 }
  0x67   : > { %2633 = vmatprep.subr.bf16.mxu0 %v2960_v1 }
  0x69   : > { %2611 = vmatpush3.bf16.msra.mxu1 %v2586_v27 }
  0x6a   : > { %2635 = vmatpush3.bf16.msra.mxu0 %v2634_v42  ;;  %2612 = vmatprep.subr.bf16.mxu1 %v2960_v1 }
  0x6b   : > { %2648 = vmatprep.subr.bf16.mxu0 %v2960_v1 }
  0x6c   : > { %2396 = vmatmul.mubr.msk.f32.vlgmr.msra.gmra.mrb[2].mxu1 %vm471_vm0, %v501_v43 }
  0x6d   : > { %2434 = vmatmul.mubr.msk.f32.vlgmr.msra.gmra.mrb[0].mxu0 %vm471_vm0, %v501_v43  ;;  %2614 = vmatpush3.bf16.msra.mxu1 %v3162_v10  ;;  %v2661_v10 = vpack.c.bf16 %v967_v9, %v966_v8  ;;  %v2722_v43 = vpack.c.bf16 %v1452_v40, %v1450_v38  ;;  %v1570_v8 = vld [vmem:[#allocation7 + $0xd0] sm:$0xff]  ;;  %v1675_v38 = vld [vmem:[#allocation7 + $0x128] sm:$0xff] }
  0x6e   : > { %2615 = vmatprep.subr.bf16.mxu1 %v2960_v1  ;;  %2414 = vmatprep.mubr.msk.f32.mxu1 %vm2961_vm2, %v2962_v2 }
  0x6f   : > { %2471 = vmatprep.mubr.msk.f32.mxu0 %vm2961_vm2, %v2962_v2  ;;  %2650 = vmatpush3.bf16.msra.mxu0 %v2649_v47 }
  0x70   : > { %2651 = vmatprep.subr.bf16.mxu0 %v2960_v1 }
  0x71   : > { %2617 = vmatpush3.bf16.msra.mxu1 %v3175_v14 }
  0x72   : > { %2618 = vmatprep.subr.bf16.mxu1 %v2960_v1 }
  0x73   : > { %2653 = vmatpush3.bf16.msra.mxu0 %v2652_v55 }
  0x74   : > { %2654 = vmatprep.subr.bf16.mxu0 %v2960_v1 }
  0x75   : > { %2620 = vmatpush3.bf16.msra.mxu1 %v2595_v22  ;;  %v1279_v22 = vld [vmem:[#allocation5 + $0x80] sm:$0xff] }
  0x76   : > { %2621 = vmatprep.subr.bf16.mxu1 %v2960_v1  ;;  %v2697_v24 = vpack.c.bf16 %v1280_v23, %v1279_v22  ;;  %v1671_v22 = vld [vmem:[#allocation7 + $0x108] sm:$0xff]  ;;  %v1673_v23 = vld [vmem:[#allocation7 + $0x118] sm:$0xff] }
  0x77   : > { %2656 = vmatpush3.bf16.msra.mxu0 %v2655_v58 }
  0x78   : > { %2657 = vmatprep.subr.bf16.mxu0 %v2960_v1 }
  0x79   : > { %2623 = vmatpush3.bf16.msra.mxu1 %v2598_v28  ;;  %v2700_v28 = vpack.c.bf16 %v1282_v26, %v1281_v25  ;;  %v1781_v25 = vld [vmem:[#allocation7 + $0x188] sm:$0xff]  ;;  %v1783_v26 = vld [vmem:[#allocation7 + $0x198] sm:$0xff] }
  0x7a   : > { %2636 = vmatprep.subr.bf16.mxu1 %v2960_v1 }
  0x7b   : > { %2659 = vmatpush3.bf16.msra.mxu0 %v2658_v61 }
  0x7c   : > { %2415 = vmatmul.mubr.msk.f32.vlgmr.msra.gmra.mrb[2].mxu1 %vm471_vm0, %v490_v31  ;;  %2660 = vmatprep.subr.bf16.mxu0 %v2960_v1  ;;  %v2703_v31 = vpack.c.bf16 %v1284_v30, %v1283_v29 }
  0x7d   : > { %2638 = vmatpush3.bf16.msra.mxu1 %v2625_v33  ;;  %2452 = vmatprep.mubr.msk.f32.mxu1 %vm2961_vm2, %v2962_v2  ;;  %v1286_v33 = vld [vmem:[#allocation5 + $0xb8] sm:$0xff] }
  0x7e   : > { %2639 = vmatprep.subr.bf16.mxu1 %v2960_v1  ;;  %v2706_v34 = vpack.c.bf16 %v1286_v33, %v1285_v32  ;;  %v2219_v33 = vld [vmem:[%s3450_s4] ss:$0 sm:$0xff] }
  0x81   : > { %2641 = vmatpush3.bf16.msra.mxu1 %v2628_v36  ;;  %v1451_v36 = vld [vmem:[#allocation7 + $0x8] sm:$0xff] }
  0x82   : > { %2642 = vmatprep.subr.bf16.mxu1 %v2960_v1 }
  0x85   : > { %2644 = vmatpush3.bf16.msra.mxu1 %v2631_v39  ;;  %v2720_v39 = vpack.c.bf16 %v1453_v37, %v1451_v36  ;;  %v1670_v36 = vld [vmem:[#allocation7 + $0x100] sm:$0xff]  ;;  %v1672_v37 = vld [vmem:[#allocation7 + $0x110] sm:$0xff] }
  0x86   : > { %2645 = vmatprep.subr.bf16.mxu1 %v2960_v1 }
  0x89   : > { %2647 = vmatpush3.bf16.msra.mxu1 %v2634_v42  ;;  %v1563_v42 = vld [vmem:[#allocation7 + $0x98] sm:$0xff] }
  0x8a   : > { %2672 = vmatprep.subr.bf16.mxu1 %v2960_v1 }
  0x8c   : > { %2453 = vmatmul.mubr.msk.f32.vlgmr.msra.gmra.mrb[2].mxu1 %vm471_vm0, %v801_v44  ;;  %v2736_v44 = vpack.c.bf16 %v1563_v42, %v1561_v41  ;;  %v1780_v41 = vld [vmem:[#allocation7 + $0x180] sm:$0xff]  ;;  %v1782_v42 = vld [vmem:[#allocation7 + $0x190] sm:$0xff] }
  0x8d   : > { %2509 = vmatprep.mubr.msk.f32.mxu1 %vm2961_vm2, %v2962_v2  ;;  %2674 = vmatpush3.bf16.msra.mxu1 %v2649_v47  ;;  %v1455_v47 = vld [vmem:[#allocation7 + $0x28] sm:$0xff] }
  0x8e   : > { %2675 = vmatprep.subr.bf16.mxu1 %v2960_v1 }
  0x91   : > { %2677 = vmatpush3.bf16.msra.mxu1 %v2652_v55  ;;  %v1567_v55 = vld [vmem:[#allocation7 + $0xb8] sm:$0xff] }
  0x92   : > { %2678 = vmatprep.subr.bf16.mxu1 %v2960_v1  ;;  %v2740_v57 = vpack.c.bf16 %v1567_v55, %v1565_v54  ;;  %v1784_v55 = vld [vmem:[#allocation7 + $0x1a0] sm:$0xff] }
  0x95   : > { %2680 = vmatpush3.bf16.msra.mxu1 %v2655_v58  ;;  %v1566_v58 = vld [vmem:[#allocation7 + $0xb0] sm:$0xff] }
  0x96   : > { %2681 = vmatprep.subr.bf16.mxu1 %v2960_v1 }
  0x99   : > { %2683 = vmatpush3.bf16.msra.mxu1 %v2658_v61  ;;  %v2742_v61 = vpack.c.bf16 %v1566_v58, %v1564_v56  ;;  %v1786_v56 = vld [vmem:[#allocation7 + $0x1b0] sm:$0xff]  ;;  %v1789_v58 = vld [vmem:[#allocation7 + $0x1c8] sm:$0xff] }
  0x9a   : > { %2684 = vmatprep.subr.bf16.mxu1 %v2960_v1 }
 0x12f   : > { %v571_v48 = vpop.f32.mrb[0].mxu1 }
 0x130   : > { %v2359_v49 = vpop.f32.mrb[1].mxu1 }
 0x131   : > { %v1457_v49 = vld [vmem:[#allocation7 + $0x38] sm:$0xff] }
 0x140   : > { %v868_v50 = vpop.f32.mrb[0].mxu0 }
 0x141   : > { %v2824_v51 = vadd.f32 %v868_v50, %v571_v48  ;;  %v2435_v52 = vpop.f32.mrb[1].mxu0  ;;  %v2738_v48 = vpack.c.bf16 %v1562_v46, %v1560_v45  ;;  %v1454_v50 = vld [vmem:[#allocation7 + $0x20] sm:$0xff]  ;;  %v1787_v45 = vld [vmem:[#allocation7 + $0x1b8] sm:$0xff] }
 0x142   : > { %v2724_v52 = vpack.c.bf16 %v1457_v49, %v1455_v47  ;;  %v1676_v49 = vld [vmem:[#allocation7 + $0x130] sm:$0xff] }
 0x15f   : > { %v942_v62 = vpop.f32.mrb[2].mxu1 }
 0x160   : > { %v947_v63 = vmax.f32 %v2824_v51, %v942_v62  ;;  %v2454_v0 = vpop.f32.mrb[3].mxu1  ;;  %v1456_v51 = vld [vmem:[#allocation7 + $0x30] sm:$0xff]  ;;  %v2728_v62 = vpack.c.bf16 %v1461_v60, %v1459_v59  ;;  %v1791_v59 = vld [vmem:[#allocation7 + $0x1d8] sm:$0xff] }
 0x161   : > { %v2726_v53 = vpack.c.bf16 %v1456_v51, %v1454_v50  ;;  %v1460_v0 = vld [vmem:[#allocation7 + $0x50] sm:$0xff]  ;;  %v2770_v50 = vpack.c.bf16 %v1782_v42, %v1780_v41  ;;  %v1679_v51 = vld [vmem:[#allocation7 + $0x148] sm:$0xff] }
 0x162   : > { %949 = vrot.lane.b32.xlu0 %v947_v63, %s2963_s18  ;;  %v1906_v42 = vld [vmem:[%s3453_s7 + $0x70] sm:$0xff] }
 0x1d4   : > { %v950_v4 = vpop.permute.xlu0 %949 }
 0x1d5   : > { %v952_v5 = vmax.f32 %v947_v63, %v950_v4  ;;  %v1458_v63 = vld [vmem:[#allocation7 + $0x40] sm:$0xff]  ;;  %v1571_v4 = vld [vmem:[#allocation7 + $0xd8] sm:$0xff] }
 0x1d7   : > { %v960_v6 = vadd.f32 %v2212_v3, %v952_v5  ;;  %v1569_v3 = vld [vmem:[#allocation7 + $0xc8] sm:$0xff]  ;;  %v2730_v5 = vpack.c.bf16 %v1460_v0, %v1458_v63  ;;  %v2774_v63 = vpack.c.bf16 %v1786_v56, %v1784_v55  ;;  %v1915_v55 = vld [vmem:[%s3453_s7 + $0xb8] sm:$0xff] }
 0x1d8   : > { %v1683_v0 = vld [vmem:[#allocation7 + $0x168] sm:$0xff] }
 0x1d9   : > { %v961_v7 = vmax.f32 %v960_v6, 0.0  ;;  %v2744_v6 = vpack.c.bf16 %v1571_v4, %v1569_v3  ;;  %v1685_v3 = vld [vmem:[#allocation7 + $0x178] sm:$0xff]  ;;  %v2776_v4 = vpack.c.bf16 %v1791_v59, %v1789_v58  ;;  %v2964_v58 = vmov 1966171168  }
 0x1da   : > { %v1544_v59 = vunpack.c.l.s4 %v2964_v58 }
 0x1db   : > { %965 = vst.msk [vmem:[#allocation3 + $0x8] sm:$0xff] %vm471_vm0, %v961_v7  ;;  %v1568_v7 = vld [vmem:[#allocation7 + $0xc0] sm:$0xff] }
 0x1dc   : > { %v2746_v9 = vpack.c.bf16 %v1570_v8, %v1568_v7  ;;  %v1793_v8 = vld [vmem:[#allocation7 + $0x1e8] sm:$0xff] }
 0x1e2   : > { %v977_v13 = vld [vmem:[#allocation3 + $0x8] ss:$2 sm:$0xf]  ;;  %v988_v14 = vld [vmem:[#allocation3 + $0x9] ss:$2 sm:$0xf] }
 0x1e3   : > { %2472 = vmatmul.mubr.msk.f32.vlgmr.msra.gmra.mrb[2].mxu0 %vm471_vm0, %v977_v13  ;;  %2510 = vmatmul.mubr.msk.f32.vlgmr.msra.gmra.mrb[4].mxu1 %vm471_vm0, %v988_v14  ;;  %v975_v27 = vld [vmem:[#allocation3 + $0x7] ss:$2 sm:$0xf]  ;;  %v1288_v35 = vld [vmem:[#allocation3 + $0xa] ss:$2 sm:$0xf] }
 0x1e4   : > { %2662 = vmatpush3.bf16.msra.mxu0 %v2661_v10  ;;  %2686 = vmatpush3.bf16.msra.mxu1 %v2661_v10  ;;  %v1463_v10 = vld [vmem:[#allocation7 + $0x68] sm:$0xff] }
 0x1e5   : > { %2663 = vmatprep.subr.bf16.mxu0 %v2960_v1  ;;  %2687 = vmatprep.subr.bf16.mxu1 %v2960_v1  ;;  %v2732_v12 = vpack.c.bf16 %v1465_v11, %v1463_v10  ;;  %v2764_v10 = vpack.c.bf16 %v1685_v3, %v1683_v0  ;;  %v1682_v11 = vld [vmem:[#allocation7 + $0x160] sm:$0xff] }
 0x1e6   : > { %2490 = vmatprep.mubr.msk.f32.mxu0 %vm2961_vm2, %v2962_v2  ;;  %2528 = vmatprep.mubr.msk.f32.mxu1 %vm2961_vm2, %v2962_v2 }
 0x1e8   : > { %2665 = vmatpush3.bf16.msra.mxu0 %v2664_v15  ;;  %2689 = vmatpush3.bf16.msra.mxu1 %v2664_v15 }
 0x1e9   : > { %2666 = vmatprep.subr.bf16.mxu0 %v2960_v1  ;;  %2690 = vmatprep.subr.bf16.mxu1 %v2960_v1 }
 0x1ec   : > { %2668 = vmatpush3.bf16.msra.mxu0 %v2667_v18  ;;  %2692 = vmatpush3.bf16.msra.mxu1 %v2667_v18  ;;  %v2748_v18 = vpack.c.bf16 %v1575_v17, %v1573_v16  ;;  %v1794_v16 = vld [vmem:[#allocation7 + $0x1f0] sm:$0xff] }
 0x1ed   : > { %2669 = vmatprep.subr.bf16.mxu0 %v2960_v1  ;;  %2693 = vmatprep.subr.bf16.mxu1 %v2960_v1 }
 0x1f0   : > { %2671 = vmatpush3.bf16.msra.mxu0 %v2670_v21  ;;  %2695 = vmatpush3.bf16.msra.mxu1 %v2670_v21  ;;  %v2750_v21 = vpack.c.bf16 %v1574_v20, %v1572_v19  ;;  %v1893_v19 = vld [vmem:[%s3453_s7 + $0x8] sm:$0xff] }
 0x1f1   : > { %2696 = vmatprep.subr.bf16.mxu0 %v2960_v1  ;;  %2708 = vmatprep.subr.bf16.mxu1 %v2960_v1 }
 0x1f3   : > { %2491 = vmatmul.mubr.msk.f32.vlgmr.msra.gmra.mrb[2].mxu0 %vm471_vm0, %v975_v27  ;;  %2529 = vmatmul.mubr.msk.f32.vlgmr.msra.gmra.mrb[4].mxu1 %vm471_vm0, %v977_v13  ;;  %v1462_v13 = vld [vmem:[#allocation7 + $0x60] sm:$0xff]  ;;  %v2768_v27 = vpack.c.bf16 %v1783_v26, %v1781_v25 }
 0x1f4   : > { %2698 = vmatpush3.bf16.msra.mxu0 %v2697_v24  ;;  %2710 = vmatpush3.bf16.msra.mxu1 %v2697_v24  ;;  %v2752_v24 = vpack.c.bf16 %v1673_v23, %v1671_v22  ;;  %v1894_v23 = vld [vmem:[%s3453_s7 + $0x10] sm:$0xff] }
 0x1f5   : > { %2699 = vmatprep.subr.bf16.mxu0 %v2960_v1  ;;  %2711 = vmatprep.subr.bf16.mxu1 %v2960_v1 }
 0x1f6   : > { %2547 = vmatprep.mubr.msk.f32.mxu0 %vm2961_vm2, %v2962_v2  ;;  %2566 = vmatprep.mubr.msk.f32.mxu1 %vm2961_vm2, %v2962_v2 }
 0x1f8   : > { %2701 = vmatpush3.bf16.msra.mxu0 %v2700_v28  ;;  %2713 = vmatpush3.bf16.msra.mxu1 %v2700_v28 }
 0x1f9   : > { %2702 = vmatprep.subr.bf16.mxu0 %v2960_v1  ;;  %2714 = vmatprep.subr.bf16.mxu1 %v2960_v1 }
 0x1fc   : > { %2704 = vmatpush3.bf16.msra.mxu0 %v2703_v31  ;;  %2716 = vmatpush3.bf16.msra.mxu1 %v2703_v31 }
 0x1fd   : > { %2705 = vmatprep.subr.bf16.mxu0 %v2960_v1  ;;  %2717 = vmatprep.subr.bf16.mxu1 %v2960_v1 }
 0x200   : > { %2707 = vmatpush3.bf16.msra.mxu0 %v2706_v34  ;;  %2719 = vmatpush3.bf16.msra.mxu1 %v2706_v34 }
 0x201   : > { %2721 = vmatprep.subr.bf16.mxu0 %v2720_v39  ;;  %2737 = vmatprep.subr.bf16.mxu1 %v2736_v44  ;;  %v1677_v39 = vld [vmem:[#allocation7 + $0x138] sm:$0xff]  ;;  %v1785_v44 = vld [vmem:[#allocation7 + $0x1a8] sm:$0xff] }
 0x202   : > { %v2756_v47 = vpack.c.bf16 %v1677_v39, %v1675_v38  ;;  %v2772_v54 = vpack.c.bf16 %v1787_v45, %v1785_v44  ;;  %v1904_v39 = vld [vmem:[%s3453_s7 + $0x60] sm:$0xff] }
 0x203   : > { %2548 = vmatmul.mubr.msk.f32.vlgmr.msra.gmra.mrb[2].mxu0 %vm471_vm0, %v988_v14  ;;  %2567 = vmatmul.mubr.msk.f32.vlgmr.msra.gmra.mrb[4].mxu1 %vm471_vm0, %v1288_v35  ;;  %v1464_v14 = vld [vmem:[#allocation7 + $0x70] sm:$0xff]  ;;  %v1908_v45 = vld [vmem:[%s3453_s7 + $0x80] sm:$0xff] }
 0x204   : > { %1533 = vmatprep.mubr.f32.mxu0 %v2962_v2  ;;  %1643 = vmatprep.mubr.f32.mxu1 %v2962_v2  ;;  %v2734_v15 = vpack.c.bf16 %v1464_v14, %v1462_v13 }
 0x205   : > { %2723 = vmatpush1.bf16.msra.mxu0 %v2722_v43  ;;  %2739 = vmatpush1.bf16.msra.mxu1 %v2738_v48  ;;  %v2754_v43 = vpack.c.bf16 %v1672_v37, %v1670_v36  ;;  %v1674_v48 = vld [vmem:[#allocation7 + $0x120] sm:$0xff]  ;;  %v1902_v36 = vld [vmem:[%s3453_s7 + $0x50] sm:$0xff] }
 0x206   : > { %2725 = vmatprep.subr.bf16.mxu0 %v2724_v52  ;;  %2741 = vmatprep.subr.bf16.mxu1 %v2740_v57  ;;  %v1681_v52 = vld [vmem:[#allocation7 + $0x158] sm:$0xff]  ;;  %v2758_v57 = vpack.c.bf16 %v1676_v49, %v1674_v48 }
 0x207   : > { %v2760_v60 = vpack.c.bf16 %v1681_v52, %v1679_v51  ;;  %v1903_v37 = vld [vmem:[%s3453_s7 + $0x58] sm:$0xff]  ;;  %v1910_v48 = vld [vmem:[%s3453_s7 + $0x90] sm:$0xff]  ;;  %v1912_v51 = vld [vmem:[%s3453_s7 + $0xa0] sm:$0xff] }
 0x208   : > { %v2800_v38 = vpack.c.bf16 %v1903_v37, %v1902_v36  ;;  %v1911_v49 = vld [vmem:[%s3453_s7 + $0x98] sm:$0xff]  ;;  %v1913_v52 = vld [vmem:[%s3453_s7 + $0xa8] sm:$0xff] }
 0x209   : > { %2727 = vmatpush1.bf16.msra.mxu0 %v2726_v53  ;;  %2743 = vmatpush1.bf16.msra.mxu1 %v2742_v61  ;;  %v1678_v61 = vld [vmem:[#allocation7 + $0x140] sm:$0xff] }
 0x20a   : > { %2729 = vmatprep.subr.bf16.mxu0 %v2728_v62  ;;  %2745 = vmatprep.subr.bf16.mxu1 %v2744_v6  ;;  %v1680_v62 = vld [vmem:[#allocation7 + $0x150] sm:$0xff] }
 0x20b   : > { %v1790_v6 = vld [vmem:[#allocation7 + $0x1d0] sm:$0xff]  ;;  %v2762_v7 = vpack.c.bf16 %v1680_v62, %v1678_v61 }
 0x20d   : > { %2731 = vmatpush1.bf16.msra.mxu0 %v2730_v5  ;;  %2747 = vmatpush1.bf16.msra.mxu1 %v2746_v9  ;;  %v1788_v5 = vld [vmem:[#allocation7 + $0x1c0] sm:$0xff]  ;;  %v1795_v9 = vld [vmem:[#allocation7 + $0x1f8] sm:$0xff] }
 0x20e   : > { %2733 = vmatprep.subr.bf16.mxu0 %v2732_v12  ;;  %2749 = vmatprep.subr.bf16.mxu1 %v2748_v18  ;;  %v1684_v12 = vld [vmem:[#allocation7 + $0x170] sm:$0xff]  ;;  %v2778_v13 = vpack.c.bf16 %v1790_v6, %v1788_v5  ;;  %v2780_v14 = vpack.c.bf16 %v1795_v9, %v1793_v8  ;;  %v1892_v18 = vld [vmem:[%s3453_s7] sm:$0xff] }
 0x20f   : > { %v2766_v17 = vpack.c.bf16 %v1684_v12, %v1682_v11 }
 0x211   : > { %2735 = vmatpush1.bf16.msra.mxu0 %v2734_v15  ;;  %2751 = vmatpush1.bf16.msra.mxu1 %v2750_v21  ;;  %v1792_v15 = vld [vmem:[#allocation7 + $0x1e0] sm:$0xff]  ;;  %v2785_v21 = vpack.c.bf16 %v1893_v19, %v1892_v18 }
 0x212   : > { %2753 = vmatprep.subr.bf16.mxu0 %v2752_v24  ;;  %2769 = vmatprep.subr.bf16.mxu1 %v2768_v27  ;;  %v2782_v20 = vpack.c.bf16 %v1794_v16, %v1792_v15  ;;  %v1895_v24 = vld [vmem:[%s3453_s7 + $0x18] sm:$0xff]  ;;  %v1896_v27 = vld [vmem:[%s3453_s7 + $0x20] sm:$0xff] }
 0x213   : > { %v2788_v26 = vpack.c.bf16 %v1895_v24, %v1894_v23 }
 0x2d6   : > { %v1355_v28 = vpop.f32.mrb[2].mxu0  ;;  %v1429_v29 = vpop.f32.mrb[4].mxu1 }
 0x2d7   : > { %v1434_v30 = vmax.f32 %v1355_v28, %v1429_v29  ;;  %v2549_v31 = vpop.f32.mrb[3].mxu0  ;;  %v2568_v32 = vpop.f32.mrb[5].mxu1  ;;  %v1897_v28 = vld [vmem:[%s3453_s7 + $0x28] sm:$0xff] }
 0x2d8   : > { %v2791_v29 = vpack.c.bf16 %v1897_v28, %v1896_v27  ;;  %v1899_v31 = vld [vmem:[%s3453_s7 + $0x38] sm:$0xff] }
 0x2d9   : > { %1436 = vrot.lane.b32.xlu0 %v1434_v30, %s2963_s18 }
 0x34b   : > { %v1437_v34 = vpop.permute.xlu0 %1436 }
 0x34c   : > { %v1439_v35 = vmax.f32 %v1434_v30, %v1437_v34  ;;  %v1898_v30 = vld [vmem:[%s3453_s7 + $0x30] sm:$0xff]  ;;  %v1901_v34 = vld [vmem:[%s3453_s7 + $0x48] sm:$0xff] }
 0x34d   : > { %v2794_v32 = vpack.c.bf16 %v1899_v31, %v1898_v30  ;;  %v1917_v31 = vld [vmem:[%s3454_s8] sm:$0x1] }
 0x34e   : > { %v1447_v40 = vadd.f32 %v2219_v33, %v1439_v35  ;;  %v1900_v33 = vld [vmem:[%s3453_s7 + $0x40] sm:$0xff] }
 0x34f   : > { %v2797_v35 = vpack.c.bf16 %v1901_v34, %v1900_v33 }
 0x350   : > { %v3318_v46 = vmax.f32 %v1447_v40, 0.0  ;;  %v1905_v40 = vld [vmem:[%s3453_s7 + $0x68] sm:$0xff] }
 0x351   : > { %v2803_v41 = vpack.c.bf16 %v1905_v40, %v1904_v39 }
 0x352   : > { %v1576_v53 = vrot.slane %v3318_v46, 1  ;;  %2220 = vmatmul.mubr.msk.f32.vlgmr.msra.gmra.mrb[4].mxu0 %vm471_vm0, %v3318_v46  ;;  %v1686_v22 = vrot.slane %v3318_v46, 2  ;;  %v1796_v25 = vrot.slane %v3318_v46, 3  ;;  %v1909_v46 = vld [vmem:[%s3453_s7 + $0x88] sm:$0xff] }
 0x353   : > { %2755 = vmatpush1.bf16.msra.mxu0 %v2754_v43  ;;  %1753 = vmatprep.mubr.f32.mxu0 %v2962_v2  ;;  %v1907_v43 = vld [vmem:[%s3453_s7 + $0x78] sm:$0xff] }
 0x354   : > { %2221 = vmatmul.mubr.msk.f32.vlgmr.msra.gmra.mrb[6].mxu1 %vm471_vm0, %v1576_v53  ;;  %2757 = vmatprep.subr.bf16.mxu0 %v2756_v47  ;;  %v2806_v44 = vpack.c.bf16 %v1907_v43, %v1906_v42  ;;  %v2809_v47 = vpack.c.bf16 %v1909_v46, %v1908_v45  ;;  %v2815_v53 = vpack.c.bf16 %v1913_v52, %v1912_v51  ;;  %v2028_v45 = vld [vmem:[%s3455_s9 + $0x8] sm:$0x3] }
 0x355   : > { %2771 = vmatpush1.bf16.msra.mxu1 %v2770_v50  ;;  %1863 = vmatprep.mubr.f32.mxu1 %v2962_v2  ;;  %v2812_v50 = vpack.c.bf16 %v1911_v49, %v1910_v48 }
 0x356   : > { %2773 = vmatprep.subr.bf16.mxu1 %v2772_v54  ;;  %v1914_v54 = vld [vmem:[%s3453_s7 + $0xb0] sm:$0xff] }
 0x357   : > { %2759 = vmatpush1.bf16.msra.mxu0 %v2758_v57  ;;  %v2818_v56 = vpack.c.bf16 %v1915_v55, %v1914_v54  ;;  %v1916_v57 = vld [vmem:[%s3453_s7 + $0xc0] sm:$0xff] }
 0x358   : > { %2761 = vmatprep.subr.bf16.mxu0 %v2760_v60  ;;  %v1545_v60 = vunpack.c.0.s8 %v1544_v59  ;;  %v2023_v54 = vld [vmem:[%s3457_s11] sm:$0x1]  ;;  %v2029_v59 = vld [vmem:[#allocation4] sm:$0x1] }
 0x359   : > { %2775 = vmatpush1.bf16.msra.mxu1 %v2774_v63 }
 0x35a   : > { %2777 = vmatprep.subr.bf16.mxu1 %v2776_v4 }
 0x35b   : > { %2763 = vmatpush1.bf16.msra.mxu0 %v2762_v7 }
 0x35c   : > { %2765 = vmatprep.subr.bf16.mxu0 %v2764_v10 }
 0x35d   : > { %2779 = vmatpush1.bf16.msra.mxu1 %v2778_v13 }
 0x35e   : > { %2781 = vmatprep.subr.bf16.mxu1 %v2780_v14 }
 0x35f   : > { %2767 = vmatpush1.bf16.msra.mxu0 %v2766_v17 }
 0x360   : > { %2784 = vmatprep.subr.bf16.mxu0 %v2960_v1 }
 0x361   : > { %2783 = vmatpush1.bf16.msra.mxu1 %v2782_v20 }
 0x362   : > { %2222 = vmatmul.mubr.msk.f32.vlgmr.msra.gmra.mrb[6].mxu0 %vm471_vm0, %v1686_v22  ;;  %2820 = vmatprep.subr.bf16.mxu1 %v2960_v1 }
 0x363   : > { %2786 = vmatpush1.bf16.msra.mxu0 %v2785_v21 }
 0x364   : > { %2223 = vmatmul.mubr.msk.f32.vlgmr.msra.gmra.mrb[8].mxu1 %vm471_vm0, %v1796_v25  ;;  %2787 = vmatprep.subr.bf16.mxu0 %v2960_v1 }
 0x365   : > { %2573 = vmatprep.mubr.msk.f32.mxu1 %vm2961_vm2, %v2962_v2 }
 0x367   : > { %2789 = vmatpush1.bf16.msra.mxu0 %v2788_v26 }
 0x368   : > { %2790 = vmatprep.subr.bf16.mxu0 %v2960_v1 }
 0x36b   : > { %2792 = vmatpush1.bf16.msra.mxu0 %v2791_v29 }
 0x36c   : > { %2793 = vmatprep.subr.bf16.mxu0 %v2960_v1 }
 0x36f   : > { %2795 = vmatpush1.bf16.msra.mxu0 %v2794_v32 }
 0x370   : > { %2796 = vmatprep.subr.bf16.mxu0 %v2960_v1 }
 0x373   : > { %2798 = vmatpush1.bf16.msra.mxu0 %v2797_v35 }
 0x374   : > { %2799 = vmatprep.subr.bf16.mxu0 %v2960_v1 }
 0x377   : > { %2801 = vmatpush1.bf16.msra.mxu0 %v2800_v38 }
 0x378   : > { %2802 = vmatprep.subr.bf16.mxu0 %v2960_v1 }
 0x37b   : > { %2804 = vmatpush1.bf16.msra.mxu0 %v2803_v41 }
 0x37c   : > { %2805 = vmatprep.subr.bf16.mxu0 %v2960_v1 }
 0x37f   : > { %2807 = vmatpush1.bf16.msra.mxu0 %v2806_v44  ;;  %v2027_v44 = vld [vmem:[%s3455_s9] sm:$0xff] }
 0x380   : > { %2808 = vmatprep.subr.bf16.mxu0 %v2960_v1  ;;  %v2821_v46 = vpack.c.bf16 %v2028_v45, %v2027_v44 }
 0x382   : > { %2823 = vmatpush3.bf16.msk.msra.mxu1 %vm2822_vm9, %v2821_v46 }
 0x383   : > { %2810 = vmatpush1.bf16.msra.mxu0 %v2809_v47 }
 0x384   : > { %2811 = vmatprep.subr.bf16.mxu0 %v2960_v1 }
 0x387   : > { %2813 = vmatpush1.bf16.msra.mxu0 %v2812_v50 }
 0x388   : > { %2814 = vmatprep.subr.bf16.mxu0 %v2960_v1 }
 0x38b   : > { %2816 = vmatpush1.bf16.msra.mxu0 %v2815_v53 }
 0x38c   : > { %2817 = vmatprep.subr.bf16.mxu0 %v2960_v1  ;;  %v1546_v1 = vlaneseq }
 0x38e   : > { %v1547_v61 = vshrl.u32 %v1546_v1, 7 }
 0x38f   : > { %2819 = vmatpush1.bf16.msra.mxu0 %v2818_v56  ;;  %v2025_v56 = vld [vmem:[%s3458_s12] sm:$0x1] }
 0x390   : > { %1979 = vmatprep.subr.mxu0 %v2962_v2  ;;  %v1548_v63 = vsub.s32 %v1545_v60, %v1547_v61  ;;  %v1449_v2 = vld [vmem:[%s3452_s6] sm:$0x3]  ;;  %v1925_v25 = vsub.s32 1, %v1547_v61  ;;  %v1921_v26 = vsub.s32 0, %v1547_v61 }
 0x393   : > { %1980 = vmatpush1.msra.mxu0 %v1916_v57 }
 0x425   : > { %v1535_v62 = vpop.f32.mrb[4].mxu0 }
 0x426   : > { %v1537_v0 = vpop.f32.mrb[5].mxu0 }
 0x427   : > { %v1542_v3 = vcombine.low %v1535_v62, %v1537_v0  ;;  %v1645_v4 = vpop.f32.mrb[6].mxu1 }
 0x428   : > { %v1647_v5 = vpop.f32.mrb[7].mxu1 }
 0x429   : > { %v1549_v6 = vrot.slane %v1542_v3, %v1548_v63  ;;  %v1652_v7 = vcombine.low %v1645_v4, %v1647_v5 }
 0x42b   : > { %v1556_v8 = vrot.slane %v1549_v6, %v1548_v63  ;;  %v1659_v9 = vrot.slane %v1652_v7, %v1548_v63 }
 0x42d   : > { %v1558_v10 = vadd.f32 %v1556_v8, %v1449_v2  ;;  %v1666_v11 = vrot.slane %v1659_v9, %v1548_v63 }
 0x42f   : > { %v1668_v12 = vadd.f32 %v1666_v11, %v1558_v10 }
 0x435   : > { %v1755_v13 = vpop.f32.mrb[6].mxu0 }
 0x436   : > { %v1757_v14 = vpop.f32.mrb[7].mxu0 }
 0x437   : > { %v1762_v15 = vcombine.low %v1755_v13, %v1757_v14  ;;  %v1865_v16 = vpop.f32.mrb[8].mxu1 }
 0x438   : > { %v1867_v17 = vpop.f32.mrb[9].mxu1 }
 0x439   : > { %v1769_v18 = vrot.slane %v1762_v15, %v1548_v63  ;;  %v1872_v19 = vcombine.low %v1865_v16, %v1867_v17 }
 0x43b   : > { %v1776_v20 = vrot.slane %v1769_v18, %v1548_v63  ;;  %v1879_v21 = vrot.slane %v1872_v19, %v1548_v63 }
 0x43d   : > { %v1778_v22 = vadd.f32 %v1776_v20, %v1668_v12  ;;  %v1886_v23 = vrot.slane %v1879_v21, %v1548_v63 }
 0x43f   : > { %v1888_v24 = vadd.f32 %v1886_v23, %v1778_v22 }
 0x441   : > { %v1890_v27 = vmul.f32 0.01, %v1888_v24  ;;  %vm1889_vm3 = vcmp.ge.f32.partialorder %v1888_v24, 0.0 }
 0x443   : > { %v1891_v28 = vsel %vm1889_vm3, %v1888_v24, %v1890_v27 }
 0x444   : > { %v1926_v29 = vrot.slane %v1891_v28, %v1925_v25  ;;  %v1922_v30 = vrot.slane %v1891_v28, %v1921_v26 }
 0x446   : > { %2224 = vmatprep.mubr.msk.f32.mxu0 %vm1928_vm4, %v1926_v29 }
 0x447   : > { %1996 = vmatmul.mubr.f32.vlgmr.msra.gmra.mrb[8].mxu0 %v1922_v30 }
 0x51a   : > { %v1997_v32 = vpop.f32.mrb[8].mxu0 }
 0x51b   : > { %v1998_v33 = vadd.f32 %v1997_v32, %v1917_v31  ;;  %v1999_v34 = vpop.f32.mrb[9].mxu0 }
 0x51d   : > { %vm2001_vm5 = vcmp.ge.f32.partialorder %v1998_v33, 0.0  ;;  %v2002_v35 = vmul.f32 0.01, %v1998_v33 }
 0x51f   : > { %v2003_v36 = vsel %vm2001_vm5, %v1998_v33, %v2002_v35 }
 0x520   : > { %v2016_v37 = vsel %vm2004_vm6, %v2003_v36, 0.0  ;;  %v2005_v38 = vsel %vm2004_vm6, %v2003_v36, -inf  ;;  %v2019_v52 = vmul.f32 0.01, %v2003_v36 }
 0x521   : > { %2017 = vadd.xlane.f32.xlu0 %v2016_v37  ;;  %2006 = vmax.xlane.f32.xlu1 %v2005_v38 }
 0x5ae   : > { %v2007_v39 = vpop.xlane.xlu1 %2006  ;;  %v2018_v50 = vpop.xlane.xlu0 %2017 }
 0x5af   : > { %v2008_v40 = vsub.f32 %v2003_v36, %v2007_v39 }
 0x5b1   : > { %v2009_v41 = vmul.f32 1.442695, %v2008_v40 }
 0x5b3   : > { %2878 = vpow2.f32 %v2009_v41 }
 0x5bd   : > { %v2879_v42 = vpop.eup %2878 }
 0x5be   : > { %v2011_v43 = vsel %vm2004_vm6, %v2879_v42, 0.0 }
 0x5bf   : > { %2012 = vadd.xlane.f32.xlu1 %v2011_v43 }
 0x64c   : > { %v2013_v47 = vpop.xlane.xlu1 %2012 }
 0x64d   : > { %2880 = vrcp.f32 %v2013_v47 }
 0x657   : > { %v2881_v48 = vpop.eup %2880 }
 0x658   : > { %v2015_v49 = vmul.f32 %v2881_v48, %v2879_v42 }
 0x65a   : > { %v2020_v51 = vmul.f32 %v2018_v50, %v2015_v49 }
 0x65c   : > { %v2021_v53 = vmul.f32 0.99, %v2020_v51 }
 0x65e   : > { %v2022_v55 = vadd.f32 %v2021_v53, %v2019_v52 }
 0x660   : > { %v2024_v57 = vmul.f32 %v2023_v54, %v2022_v55 }
 0x662   : > { %v2026_v58 = vadd.f32 %v2025_v56, %v2024_v57 }
 0x664   : > { %2574 = vmatmul.mubr.msk.f32.vlgmr.msra.gmra.mrb[10].mxu1 %vm2030_vm10, %v2026_v58 }
 0x737   : > { %v2104_v1 = vpop.f32.mrb[10].mxu1 }
 0x738   : > { %v2105_v60 = vadd.f32 %v2104_v1, %v2029_v59  ;;  %v2575_v61 = vpop.f32.mrb[11].mxu1 }
 0x73a   : > { %2109 = vst.msk [vmem:[%s468_s23] sm:$0x1] %vm2108_vm11, %v2105_v60 }
 0x73b PF: > { %s27_s27 = sadd.s32 1, %s2952_s27  }
 0x73c   : > { %p24_p5 = scmp.ge.s32.totalorder %s27_s27, 4  }
 0x73e   :  { %26 = sbr.rel (!%p24_p5) target bundleno = 5 (0x5), region = 126 }
 0x745   :  { %2127 = vsyncpa [#allocation6], 1 }
 0x746   :  { %2129 = vsyncpa [#allocation6 + $0x1], 1 }
 0x747   :  { %2130 = vsyncpa [#allocation8], 1 }

</bundles_post_ra>
